<compile_context>
chip_gen: v6e
topology: v6e:2x2x1
jax: 0.10.0
libtpu: 0.0.40
codegen_flags: <defaults>
</compile_context>

<pallas_src>
import functools

import jax
import jax.numpy as jnp
from jax.experimental import pallas as pl
from jax.experimental.pallas import tpu as pltpu


def _round_up(v, m):
    return (v + m - 1) // m * m


# ---------------------------------------------------------------------------
# Fused kernel. grid = (phase, batch_tile); phase 0 = stats, phase 1 = apply.
# ---------------------------------------------------------------------------
def _mlp_kernel(x_ref, w1_ref, gamma_ref, beta_ref, w2t_ref, b2t_ref,
                out_ref, sum_ref, sq_ref,
                *, n_valid, tile_n, eps, needs_mask):
    phase = pl.program_id(0)            # 0 = batch statistics, 1 = apply
    i = pl.program_id(1)                # batch tile index
    last = pl.num_programs(1) - 1

    # Linear1 on the MXU (bf16 operands, f32 accumulation). The Linear1 bias
    # is omitted: it is exactly cancelled by the BatchNorm that follows.
    h = jnp.dot(x_ref[...].astype(w1_ref.dtype), w1_ref[...],
                preferred_element_type=jnp.float32)            # [tn, H] f32

    # ---------------- phase 0: global batch statistics ----------------------
    @pl.when(jnp.logical_and(phase == 0, i == 0))
    def _init():
        sum_ref[...] = jnp.zeros_like(sum_ref)
        sq_ref[...] = jnp.zeros_like(sq_ref)

    def _accumulate(hv):
        sum_ref[...] += jnp.sum(hv, axis=0, keepdims=True)
        sq_ref[...] += jnp.sum(hv * hv, axis=0, keepdims=True)

    if needs_mask:  # static: only when n % tile_n != 0
        @pl.when(jnp.logical_and(phase == 0, i < last))
        def _acc_full():
            _accumulate(h)

        # Only the single ragged last tile pays the iota/compare/select.
        @pl.when(jnp.logical_and(phase == 0, i == last))
        def _acc_masked():
            row = i * tile_n + jax.lax.broadcasted_iota(jnp.int32, h.shape, 0)
            _accumulate(jnp.where(row < n_valid, h, 0.0))
    else:
        @pl.when(phase == 0)
        def _acc():
            _accumulate(h)

    @pl.when(jnp.logical_and(phase == 0, i == last))
    def _finalize():
        inv_n = 1.0 / float(n_valid)
        mean = sum_ref[...] * inv_n
        var = jnp.maximum(sq_ref[...] * inv_n - mean * mean, 0.0)  # biased var
        scale = gamma_ref[...] * jax.lax.rsqrt(var + eps)
        sum_ref[...] = scale                                # fused BN scale
        sq_ref[...] = beta_ref[...] - mean * scale          # fused BN shift

    # -------- phase 1: BN affine -> ReLU -> Linear2, transposed store -------
    @pl.when(phase == 1)
    def _apply():
        a = jnp.maximum(h * sum_ref[...] + sq_ref[...], 0.0)   # BN + ReLU, f32
        # out.T [C, tn] = w2.T [C, H] (contract H) a [tn, H]; lanes = batch.
        out_t = jax.lax.dot_general(
            w2t_ref[...], a.astype(w2t_ref.dtype),
            dimension_numbers=(((1,), (1,)), ((), ())),
            preferred_element_type=jnp.float32)
        out_ref[...] = (out_t + b2t_ref[...]).astype(out_ref.dtype)


def mlp_forward(x, w1, b1, gamma, beta, w2, b2, *,
                tile_n=4096, compute_dtype=jnp.bfloat16, eps=1e-5):
    n, f = x.shape
    hdim = w1.shape[1]
    c = w2.shape[1]
    del b1  # exactly cancelled by the BatchNorm directly after Linear1

    # Resident params (tiny): BN params in f32, MXU weights in bf16,
    # w2 pre-transposed so the kernel emits the output with batch on lanes.
    gammar = gamma.reshape(1, hdim).astype(jnp.float32)
    betar = beta.reshape(1, hdim).astype(jnp.float32)
    w1c = w1.astype(compute_dtype)                       # (F, H)
    w2t = jnp.transpose(w2).astype(compute_dtype)        # (C, H)
    b2t = b2.reshape(c, 1).astype(jnp.float32)           # bias along sublanes

    # Batch tile: multiple of 128 so the transposed output store is lane-dense.
    tn = min(_round_up(max(tile_n, 128), 128), _round_up(n, 128))
    n_tiles = pl.cdiv(n, tn)
    needs_mask = (n % tn) != 0

    resident = lambda a: pl.BlockSpec(a.shape, lambda p, i: (0,) * a.ndim)

    bytes_accessed = (2 * x.size * x.dtype.itemsize        # x read per phase
                      + w1c.size * w1c.dtype.itemsize
                      + w2t.size * w2t.dtype.itemsize
                      + 4 * (gammar.size + betar.size + b2t.size)
                      + c * n * 4)                          # transposed output

    out_t = pl.pallas_call(
        functools.partial(_mlp_kernel, n_valid=n, tile_n=tn, eps=eps,
                          needs_mask=needs_mask),
        out_shape=jax.ShapeDtypeStruct((c, n), jnp.float32),
        grid=(2, n_tiles),
        in_specs=[pl.BlockSpec((tn, f), lambda p, i: (i, 0)),
                  resident(w1c), resident(gammar), resident(betar),
                  resident(w2t), resident(b2t)],
        # Phase 0 parks the output on block (0, 0) (never written there, no
        # garbage write-back); phase 1 writes block (0, i).
        out_specs=pl.BlockSpec((c, tn), lambda p, i: (0, i * p)),
        scratch_shapes=[pltpu.VMEM((1, hdim), jnp.float32),   # sum -> scale
                        pltpu.VMEM((1, hdim), jnp.float32)],  # sumsq -> shift
        compiler_params=pltpu.CompilerParams(
            dimension_semantics=("arbitrary", "arbitrary")),
        cost_estimate=pl.CostEstimate(
            flops=4 * n * f * hdim + 2 * n * hdim * c + 6 * n * hdim,
            transcendentals=hdim,
            bytes_accessed=bytes_accessed),
    )(x, w1c, gammar, betar, w2t, b2t)

    return jnp.transpose(out_t)          # (N, C); tiny wrapper-side transpose


def reference_forward(x, w1, b1, gamma, beta, w2, b2, *,
                      compute_dtype=jnp.float32, eps=1e-5):
    """Pure-JAX reference matching the PyTorch module (includes b1; same
    bf16-MXU / f32-else precision policy as the kernel when
    compute_dtype=bfloat16)."""
    h = jnp.dot(x.astype(compute_dtype), w1.astype(compute_dtype),
                preferred_element_type=jnp.float32) + b1.reshape(1, -1)
    mean = jnp.mean(h, axis=0, keepdims=True)
    var = jnp.mean((h - mean) ** 2, axis=0, keepdims=True)
    h = (h - mean) * jax.lax.rsqrt(var + eps) * gamma.reshape(1, -1) \
        + beta.reshape(1, -1)
    h = jnp.maximum(h, 0.0)
    return jnp.dot(h.astype(compute_dtype), w2.astype(compute_dtype),
                   preferred_element_type=jnp.float32) + b2.reshape(1, -1)


if __name__ == "__main__":
    # MLP(num_features=16, num_classes=8, hidden_units=32, num_layers=2).
    # N=300 with tile_n=256 exercises multi-tile stats accumulation, the
    # ragged-tail mask, the phase transition and multi-block transposed output.
    N, F, H, C = 300, 16, 32, 8

    key = jax.random.PRNGKey(0)
    kx, k1, k2, k3, k4 = jax.random.split(key, 5)

    x = jax.random.normal(kx, (N, F), dtype=jnp.float32)
    w1 = jax.random.uniform(k1, (F, H), jnp.float32, -1.0, 1.0) / jnp.sqrt(F)
    b1 = jax.random.uniform(k2, (H,), jnp.float32, -1.0, 1.0) / jnp.sqrt(F)
    gamma = jnp.ones((H,), jnp.float32)   # BatchNorm1d default affine init
    beta = jnp.zeros((H,), jnp.float32)
    w2 = jax.random.uniform(k3, (H, C), jnp.float32, -1.0, 1.0) / jnp.sqrt(H)
    b2 = jax.random.uniform(k4, (C,), jnp.float32, -1.0, 1.0) / jnp.sqrt(H)

    out = mlp_forward(x, w1, b1, gamma, beta, w2, b2, tile_n=256)
    jax.block_until_ready(out)
    assert out.shape == (N, C)

    # Tight check against a reference with the same bf16-MXU / f32-else policy
    # (also validates the exact b1-cancellation: reference keeps b1).
    ref_bf16 = reference_forward(x, w1, b1, gamma, beta, w2, b2,
                                 compute_dtype=jnp.bfloat16)
    assert jnp.allclose(out, ref_bf16, atol=5e-3, rtol=5e-3), \
        float(jnp.max(jnp.abs(out - ref_bf16)))

    # Loose sanity check against the full-f32 PyTorch-equivalent forward
    # (difference is only bf16 MXU-operand quantization).
    ref_f32 = reference_forward(x, w1, b1, gamma, beta, w2, b2,
                                compute_dtype=jnp.float32)
    assert jnp.allclose(out, ref_f32, atol=1e-1, rtol=1e-1)

    print("KERNEL_OK")
</pallas_src>

<mosaic_0001>
module attributes {stable_mosaic.version = 11 : i64} {
  func.func @_mlp_kernel(%arg0: i32, %arg1: i32, %arg2: memref<256x16xf32, #tpu.memory_space<vmem>>, %arg3: memref<16x32xbf16, #tpu.memory_space<vmem>>, %arg4: memref<1x32xf32, #tpu.memory_space<vmem>>, %arg5: memref<1x32xf32, #tpu.memory_space<vmem>>, %arg6: memref<8x32xbf16, #tpu.memory_space<vmem>>, %arg7: memref<8x1xf32, #tpu.memory_space<vmem>>, %arg8: memref<8x256xf32, #tpu.memory_space<vmem>>, %arg9: memref<1x32xf32, #tpu.memory_space<vmem>>, %arg10: memref<1x32xf32, #tpu.memory_space<vmem>>) attributes {dimension_semantics = [#tpu.dimension_semantics<arbitrary>, #tpu.dimension_semantics<arbitrary>], iteration_bounds = array<i64: 2, 2>, scalar_prefetch = 0 : i64, scratch_operands = 2 : i64, tpu.core_type = #tpu.core_type<tc>, window_params = [{transform_indices = @transform_0, window_bounds = array<i64: 256, 16>}, {pipeline_mode = #tpu.pipeline_mode<synchronous>, transform_indices = @transform_1, window_bounds = array<i64: 16, 32>}, {pipeline_mode = #tpu.pipeline_mode<synchronous>, transform_indices = @transform_2, window_bounds = array<i64: 1, 32>}, {pipeline_mode = #tpu.pipeline_mode<synchronous>, transform_indices = @transform_3, window_bounds = array<i64: 1, 32>}, {pipeline_mode = #tpu.pipeline_mode<synchronous>, transform_indices = @transform_4, window_bounds = array<i64: 8, 32>}, {pipeline_mode = #tpu.pipeline_mode<synchronous>, transform_indices = @transform_5, window_bounds = array<i64: 8, 1>}, {transform_indices = @transform_6, window_bounds = array<i64: 8, 256>}]} {
    %c0 = arith.constant 0 : index
    %c0_0 = arith.constant 0 : index
    %0 = vector.load %arg2[%c0, %c0_0] : memref<256x16xf32, #tpu.memory_space<vmem>>, vector<256x16xf32>
    %1 = arith.truncf %0 : vector<256x16xf32> to vector<256x16xbf16>
    %c0_1 = arith.constant 0 : index
    %c0_2 = arith.constant 0 : index
    %2 = vector.load %arg3[%c0_1, %c0_2] : memref<16x32xbf16, #tpu.memory_space<vmem>>, vector<16x32xbf16>
    %cst = arith.constant dense<0.000000e+00> : vector<256x32xf32>
    %3 = tpu.matmul %1, %2, %cst {dimension_numbers = #tpu.dot_dimension_numbers<[1], [0], [0], [1], [0, 0, 1, 1], [], []>} : vector<256x16xbf16>, vector<16x32xbf16>, vector<256x32xf32> -> vector<256x32xf32>
    %c0_i32 = arith.constant 0 : i32
    %4 = arith.cmpi eq, %arg0, %c0_i32 : i32
    %c0_i32_3 = arith.constant 0 : i32
    %5 = arith.cmpi eq, %arg1, %c0_i32_3 : i32
    %6 = arith.andi %4, %5 : i1
    %7 = arith.extui %6 : i1 to i32
    %c0_i32_4 = arith.constant 0 : i32
    %8 = arith.cmpi ne, %7, %c0_i32_4 : i32
    scf.if %8 {
      %cst_15 = arith.constant 0.000000e+00 : f32
      %27 = vector.broadcast %cst_15 : f32 to vector<1x32xf32>
      %c0_16 = arith.constant 0 : index
      %c0_17 = arith.constant 0 : index
      %28 = vector.load %arg9[%c0_16, %c0_17] : memref<1x32xf32, #tpu.memory_space<vmem>>, vector<1x32xf32>
      tpu.vector_store %arg9[%c0_16, %c0_17], %27 {strides = array<i32>} : memref<1x32xf32, #tpu.memory_space<vmem>>, vector<1x32xf32>,
      %cst_18 = arith.constant 0.000000e+00 : f32
      %29 = vector.broadcast %cst_18 : f32 to vector<1x32xf32>
      %c0_19 = arith.constant 0 : index
      %c0_20 = arith.constant 0 : index
      %30 = vector.load %arg10[%c0_19, %c0_20] : memref<1x32xf32, #tpu.memory_space<vmem>>, vector<1x32xf32>
      tpu.vector_store %arg10[%c0_19, %c0_20], %29 {strides = array<i32>} : memref<1x32xf32, #tpu.memory_space<vmem>>, vector<1x32xf32>,
    } else {
    }
    %c0_i32_5 = arith.constant 0 : i32
    %9 = arith.cmpi eq, %arg0, %c0_i32_5 : i32
    %c1_i32 = arith.constant 1 : i32
    %10 = arith.cmpi slt, %arg1, %c1_i32 : i32
    %11 = arith.andi %9, %10 : i1
    %12 = arith.extui %11 : i1 to i32
    %c0_i32_6 = arith.constant 0 : i32
    %13 = arith.cmpi ne, %12, %c0_i32_6 : i32
    scf.if %13 {
      %c0_15 = arith.constant 0 : index
      %c0_16 = arith.constant 0 : index
      %27 = vector.load %arg9[%c0_15, %c0_16] : memref<1x32xf32, #tpu.memory_space<vmem>>, vector<1x32xf32>
      %cst_17 = arith.constant dense<0.000000e+00> : vector<32xf32>
      %28 = vector.multi_reduction <add>, %3, %cst_17 [0] : vector<256x32xf32> to vector<32xf32>
      %29 = vector.shape_cast %28 : vector<32xf32> to vector<1x32xf32>
      %30 = arith.addf %27, %29 : vector<1x32xf32>
      %c0_18 = arith.constant 0 : index
      %c0_19 = arith.constant 0 : index
      %31 = vector.load %arg9[%c0_18, %c0_19] : memref<1x32xf32, #tpu.memory_space<vmem>>, vector<1x32xf32>
      tpu.vector_store %arg9[%c0_18, %c0_19], %30 {strides = array<i32>} : memref<1x32xf32, #tpu.memory_space<vmem>>, vector<1x32xf32>,
      %c0_20 = arith.constant 0 : index
      %c0_21 = arith.constant 0 : index
      %32 = vector.load %arg10[%c0_20, %c0_21] : memref<1x32xf32, #tpu.memory_space<vmem>>, vector<1x32xf32>
      %33 = arith.mulf %3, %3 : vector<256x32xf32>
      %cst_22 = arith.constant dense<0.000000e+00> : vector<32xf32>
      %34 = vector.multi_reduction <add>, %33, %cst_22 [0] : vector<256x32xf32> to vector<32xf32>
      %35 = vector.shape_cast %34 : vector<32xf32> to vector<1x32xf32>
      %36 = arith.addf %32, %35 : vector<1x32xf32>
      %c0_23 = arith.constant 0 : index
      %c0_24 = arith.constant 0 : index
      %37 = vector.load %arg10[%c0_23, %c0_24] : memref<1x32xf32, #tpu.memory_space<vmem>>, vector<1x32xf32>
      tpu.vector_store %arg10[%c0_23, %c0_24], %36 {strides = array<i32>} : memref<1x32xf32, #tpu.memory_space<vmem>>, vector<1x32xf32>,
    } else {
    }
    %c0_i32_7 = arith.constant 0 : i32
    %14 = arith.cmpi eq, %arg0, %c0_i32_7 : i32
    %c1_i32_8 = arith.constant 1 : i32
    %15 = arith.cmpi eq, %arg1, %c1_i32_8 : i32
    %16 = arith.andi %14, %15 : i1
    %17 = arith.extui %16 : i1 to i32
    %c0_i32_9 = arith.constant 0 : i32
    %18 = arith.cmpi ne, %17, %c0_i32_9 : i32
    scf.if %18 {
      %c256_i32 = arith.constant 256 : i32
      %27 = arith.muli %arg1, %c256_i32 : i32
      %28 = tpu.iota {dimensions = array<i32: 0>} : vector<256x32xi32>
      %29 = vector.broadcast %27 : i32 to vector<256x32xi32>
      %30 = arith.addi %29, %28 : vector<256x32xi32>
      %c300_i32 = arith.constant 300 : i32
      %31 = vector.broadcast %c300_i32 : i32 to vector<256x32xi32>
      %32 = arith.cmpi slt, %30, %31 : vector<256x32xi32>
      %cst_15 = arith.constant 0.000000e+00 : f32
      %33 = vector.broadcast %cst_15 : f32 to vector<256x32xf32>
      %34 = arith.select %32, %3, %33 : vector<256x32xi1>, vector<256x32xf32>
      %c0_16 = arith.constant 0 : index
      %c0_17 = arith.constant 0 : index
      %35 = vector.load %arg9[%c0_16, %c0_17] : memref<1x32xf32, #tpu.memory_space<vmem>>, vector<1x32xf32>
      %cst_18 = arith.constant dense<0.000000e+00> : vector<32xf32>
      %36 = vector.multi_reduction <add>, %34, %cst_18 [0] : vector<256x32xf32> to vector<32xf32>
      %37 = vector.shape_cast %36 : vector<32xf32> to vector<1x32xf32>
      %38 = arith.addf %35, %37 : vector<1x32xf32>
      %c0_19 = arith.constant 0 : index
      %c0_20 = arith.constant 0 : index
      %39 = vector.load %arg9[%c0_19, %c0_20] : memref<1x32xf32, #tpu.memory_space<vmem>>, vector<1x32xf32>
      tpu.vector_store %arg9[%c0_19, %c0_20], %38 {strides = array<i32>} : memref<1x32xf32, #tpu.memory_space<vmem>>, vector<1x32xf32>,
      %c0_21 = arith.constant 0 : index
      %c0_22 = arith.constant 0 : index
      %40 = vector.load %arg10[%c0_21, %c0_22] : memref<1x32xf32, #tpu.memory_space<vmem>>, vector<1x32xf32>
      %41 = arith.mulf %34, %34 : vector<256x32xf32>
      %cst_23 = arith.constant dense<0.000000e+00> : vector<32xf32>
      %42 = vector.multi_reduction <add>, %41, %cst_23 [0] : vector<256x32xf32> to vector<32xf32>
      %43 = vector.shape_cast %42 : vector<32xf32> to vector<1x32xf32>
      %44 = arith.addf %40, %43 : vector<1x32xf32>
      %c0_24 = arith.constant 0 : index
      %c0_25 = arith.constant 0 : index
      %45 = vector.load %arg10[%c0_24, %c0_25] : memref<1x32xf32, #tpu.memory_space<vmem>>, vector<1x32xf32>
      tpu.vector_store %arg10[%c0_24, %c0_25], %44 {strides = array<i32>} : memref<1x32xf32, #tpu.memory_space<vmem>>, vector<1x32xf32>,
    } else {
    }
    %c0_i32_10 = arith.constant 0 : i32
    %19 = arith.cmpi eq, %arg0, %c0_i32_10 : i32
    %c1_i32_11 = arith.constant 1 : i32
    %20 = arith.cmpi eq, %arg1, %c1_i32_11 : i32
    %21 = arith.andi %19, %20 : i1
    %22 = arith.extui %21 : i1 to i32
    %c0_i32_12 = arith.constant 0 : i32
    %23 = arith.cmpi ne, %22, %c0_i32_12 : i32
    scf.if %23 {
      %c0_15 = arith.constant 0 : index
      %c0_16 = arith.constant 0 : index
      %27 = vector.load %arg9[%c0_15, %c0_16] : memref<1x32xf32, #tpu.memory_space<vmem>>, vector<1x32xf32>
      %cst_17 = arith.constant 0.00333333341 : f32
      %28 = vector.broadcast %cst_17 : f32 to vector<1x32xf32>
      %29 = arith.mulf %27, %28 : vector<1x32xf32>
      %c0_18 = arith.constant 0 : index
      %c0_19 = arith.constant 0 : index
      %30 = vector.load %arg10[%c0_18, %c0_19] : memref<1x32xf32, #tpu.memory_space<vmem>>, vector<1x32xf32>
      %cst_20 = arith.constant 0.00333333341 : f32
      %31 = vector.broadcast %cst_20 : f32 to vector<1x32xf32>
      %32 = arith.mulf %30, %31 : vector<1x32xf32>
      %33 = arith.mulf %29, %29 : vector<1x32xf32>
      %34 = arith.subf %32, %33 : vector<1x32xf32>
      %cst_21 = arith.constant 0.000000e+00 : f32
      %35 = vector.broadcast %cst_21 : f32 to vector<1x32xf32>
      %36 = arith.maximumf %34, %35 : vector<1x32xf32>
      %c0_22 = arith.constant 0 : index
      %c0_23 = arith.constant 0 : index
      %37 = vector.load %arg4[%c0_22, %c0_23] : memref<1x32xf32, #tpu.memory_space<vmem>>, vector<1x32xf32>
      %cst_24 = arith.constant 9.99999974E-6 : f32
      %38 = vector.broadcast %cst_24 : f32 to vector<1x32xf32>
      %39 = arith.addf %36, %38 : vector<1x32xf32>
      %40 = math.rsqrt %39 : vector<1x32xf32>
      %41 = arith.mulf %37, %40 : vector<1x32xf32>
      %c0_25 = arith.constant 0 : index
      %c0_26 = arith.constant 0 : index
      %42 = vector.load %arg9[%c0_25, %c0_26] : memref<1x32xf32, #tpu.memory_space<vmem>>, vector<1x32xf32>
      tpu.vector_store %arg9[%c0_25, %c0_26], %41 {strides = array<i32>} : memref<1x32xf32, #tpu.memory_space<vmem>>, vector<1x32xf32>,
      %c0_27 = arith.constant 0 : index
      %c0_28 = arith.constant 0 : index
      %43 = vector.load %arg5[%c0_27, %c0_28] : memref<1x32xf32, #tpu.memory_space<vmem>>, vector<1x32xf32>
      %44 = arith.mulf %29, %41 : vector<1x32xf32>
      %45 = arith.subf %43, %44 : vector<1x32xf32>
      %c0_29 = arith.constant 0 : index
      %c0_30 = arith.constant 0 : index
      %46 = vector.load %arg10[%c0_29, %c0_30] : memref<1x32xf32, #tpu.memory_space<vmem>>, vector<1x32xf32>
      tpu.vector_store %arg10[%c0_29, %c0_30], %45 {strides = array<i32>} : memref<1x32xf32, #tpu.memory_space<vmem>>, vector<1x32xf32>,
    } else {
    }
    %c1_i32_13 = arith.constant 1 : i32
    %24 = arith.cmpi eq, %arg0, %c1_i32_13 : i32
    %25 = arith.extui %24 : i1 to i32
    %c0_i32_14 = arith.constant 0 : i32
    %26 = arith.cmpi ne, %25, %c0_i32_14 : i32
    scf.if %26 {
      %c0_15 = arith.constant 0 : index
      %c0_16 = arith.constant 0 : index
      %27 = vector.load %arg9[%c0_15, %c0_16] : memref<1x32xf32, #tpu.memory_space<vmem>>, vector<1x32xf32>
      %28 = vector.broadcast %27 : vector<1x32xf32> to vector<256x32xf32>
      %29 = arith.mulf %3, %28 : vector<256x32xf32>
      %c0_17 = arith.constant 0 : index
      %c0_18 = arith.constant 0 : index
      %30 = vector.load %arg10[%c0_17, %c0_18] : memref<1x32xf32, #tpu.memory_space<vmem>>, vector<1x32xf32>
      %31 = vector.broadcast %30 : vector<1x32xf32> to vector<256x32xf32>
      %32 = arith.addf %29, %31 : vector<256x32xf32>
      %cst_19 = arith.constant 0.000000e+00 : f32
      %33 = vector.broadcast %cst_19 : f32 to vector<256x32xf32>
      %34 = arith.maximumf %32, %33 : vector<256x32xf32>
      %c0_20 = arith.constant 0 : index
      %c0_21 = arith.constant 0 : index
      %35 = vector.load %arg6[%c0_20, %c0_21] : memref<8x32xbf16, #tpu.memory_space<vmem>>, vector<8x32xbf16>
      %36 = arith.truncf %34 : vector<256x32xf32> to vector<256x32xbf16>
      %cst_22 = arith.constant dense<0.000000e+00> : vector<8x256xf32>
      %37 = tpu.matmul %35, %36, %cst_22 {dimension_numbers = #tpu.dot_dimension_numbers<[1], [1], [0], [0], [0, 0, 1, 0], [], []>} : vector<8x32xbf16>, vector<256x32xbf16>, vector<8x256xf32> -> vector<8x256xf32>
      %c0_23 = arith.constant 0 : index
      %c0_24 = arith.constant 0 : index
      %38 = vector.load %arg7[%c0_23, %c0_24] : memref<8x1xf32, #tpu.memory_space<vmem>>, vector<8x1xf32>
      %39 = vector.broadcast %38 : vector<8x1xf32> to vector<8x256xf32>
      %40 = arith.addf %37, %39 : vector<8x256xf32>
      %c0_25 = arith.constant 0 : index
      %c0_26 = arith.constant 0 : index
      %41 = vector.load %arg8[%c0_25, %c0_26] : memref<8x256xf32, #tpu.memory_space<vmem>>, vector<8x256xf32>
      tpu.vector_store %arg8[%c0_25, %c0_26], %40 {strides = array<i32>} : memref<8x256xf32, #tpu.memory_space<vmem>>, vector<8x256xf32>,
    } else {
    }
    return
  }
  func.func @transform_0(%arg0: i32, %arg1: i32) -> (i32, i32) {
    %c0_i32 = arith.constant 0 : i32
    %c0_i32_0 = arith.constant 0 : i32
    return %arg1, %c0_i32 : i32, i32
  }
  func.func @transform_1(%arg0: i32, %arg1: i32) -> (i32, i32) {
    %c0_i32 = arith.constant 0 : i32
    %c0_i32_0 = arith.constant 0 : i32
    %c0_i32_1 = arith.constant 0 : i32
    return %c0_i32, %c0_i32_0 : i32, i32
  }
  func.func @transform_2(%arg0: i32, %arg1: i32) -> (i32, i32) {
    %c0_i32 = arith.constant 0 : i32
    %c0_i32_0 = arith.constant 0 : i32
    %c0_i32_1 = arith.constant 0 : i32
    return %c0_i32, %c0_i32_0 : i32, i32
  }
  func.func @transform_3(%arg0: i32, %arg1: i32) -> (i32, i32) {
    %c0_i32 = arith.constant 0 : i32
    %c0_i32_0 = arith.constant 0 : i32
    %c0_i32_1 = arith.constant 0 : i32
    return %c0_i32, %c0_i32_0 : i32, i32
  }
  func.func @transform_4(%arg0: i32, %arg1: i32) -> (i32, i32) {
    %c0_i32 = arith.constant 0 : i32
    %c0_i32_0 = arith.constant 0 : i32
    %c0_i32_1 = arith.constant 0 : i32
    return %c0_i32, %c0_i32_0 : i32, i32
  }
  func.func @transform_5(%arg0: i32, %arg1: i32) -> (i32, i32) {
    %c0_i32 = arith.constant 0 : i32
    %c0_i32_0 = arith.constant 0 : i32
    %c0_i32_1 = arith.constant 0 : i32
    return %c0_i32, %c0_i32_0 : i32, i32
  }
  func.func @transform_6(%arg0: i32, %arg1: i32) -> (i32, i32) {
    %0 = arith.muli %arg1, %arg0 : i32
    %c0_i32 = arith.constant 0 : i32
    %c0_i32_0 = arith.constant 0 : i32
    return %c0_i32, %0 : i32, i32
  }
}

</mosaic_0001>

<bundles_post_ra>
// kernel: tpu_custom_call.1
= control target key start
LH: loop header
LB: loop body
LE: loop exit
PB: predicated region body
PF: predicated region fallthrough
CT: control target
= control target key end

     0   :  { %11 = vsyncpa [#allocation5], 0  ;;  %s2644_s0 = inlined_call_operand.vmem [shape: f32[300,16], index: 0, kind: input, shape index: {}]   ;;  %s2645_s1 = inlined_call_operand.vmem [shape: bf16[16,32], index: 1, kind: input, shape index: {}]   ;;  %s2646_s2 = inlined_call_operand.vmem [shape: f32[1,32], index: 2, kind: input, shape index: {}]   ;;  %s2647_s3 = inlined_call_operand.vmem [shape: f32[1,32], index: 3, kind: input, shape index: {}]   ;;  %s2648_s4 = inlined_call_operand.vmem [shape: bf16[8,32], index: 4, kind: input, shape index: {}]   ;;  %s2649_s5 = inlined_call_operand.vmem [shape: f32[8,1], index: 5, kind: input, shape index: {}]   ;;  %s2650_s6 = inlined_call_operand.hbm [shape: f32[8,300], index: 6, kind: output, shape index: {}]  }
   0x1   :  { %13 = vsyncpa [#allocation5 + $0x1], 0  ;;  %s1732_s21 = smov 0   ;;  %s1734_s22 = smov 0  }
   0x2   :  { %s1736_s23 = smov 0   ;;  %s1738_s24 = smov 0  }
   0x3   :  { %s1740_s25 = smov 0   ;;  %s1742_s26 = smov 0  }
   0x4   :  { %s1744_s27 = smov 0   ;;  %s1746_s28 = smov 0  }
   0x5 LB: > { %s1405_s29 = sadd.s32 4294967295, %s1692_s28   ;;  %s1406_s30 = sadd.s32 4294967294, %s1692_s28   ;;  %s1692_s28 = sphi %s1746_s28, %s19_s28   ;;  %s1688_s27 = sphi %s1744_s27, %s2699_s27   ;;  %s1684_s26 = sphi %s1742_s26, %s2698_s26   ;;  %s1680_s25 = sphi %s1740_s25, %s2697_s25   ;;  %s1676_s24 = sphi %s1738_s24, %s2696_s24   ;;  %s1672_s23 = sphi %s1736_s23, %s2695_s23   ;;  %s1668_s22 = sphi %s1734_s22, %s2694_s22   ;;  %s1664_s21 = sphi %s1732_s21, %s2693_s21  }
   0x6   : > { %s28_s7 = sadd.s32 1, %s1684_s26  ;;  %s31_s8 = sadd.s32 1, %s1688_s27 }
   0x7   : > { %p29_p0 = scmp.ge.s32.totalorder %s28_s7, 2  ;;  %s166_s9 = smul.u32 %s1684_s26, %s1688_s27 }
   0x8   : > { %p181_p1 = scmp.ne.s32.totalorder %s1672_s23, %s1668_s22  ;;  %p182_p2 = scmp.eq.s32.totalorder %s1405_s29, 3 }
   0x9   : > { %s2701_s7 = smov (%p29_p0, %s28_s7), 0  ;;  %s2703_s8 = smov (!%p29_p0, %s31_s8), %s1688_s27 }
   0xa   : > { %p187_p3 = scmp.ne.s32.totalorder %s1668_s22, %s1664_s21  ;;  %p33_p4 = scmp.ge.s32.totalorder %s2703_s8, 2 }
   0xb   : > { %p188_p5 = scmp.eq.s32.totalorder %s1406_s30, 3  ;;  %p1785_p6 = por %p182_p2, %p181_p1 }
   0xc   : > { %p1409_p7 = scmp.ge.s32.totalorder %s1692_s28, 1  ;;  %s2705_s8 = smov (%p33_p4, %s2703_s8), 0 }
   0xd   : > { %p1792_p8 = por %p188_p5, %p187_p3  ;;  %p238_p9 = scmp.lt.s32.totalorder %s1692_s28, 5 }
   0xe   : > { %s167_s12 = smul.u32 %s2705_s8, %s2701_s7  ;;  %s171_s14 = sadd.s32 1, %s1672_s23 }
   0xf   : > { %p239_p10 = pnand %p1409_p7, %p238_p9 }
  0x10   : > { %s168_s13 = ssub.s32 %s166_s9, %s167_s12 }
  0x11   : > { %p169_p11 = scmp.eq.s32.totalorder %s168_s13, 0  ;;  %242 = sbr.rel (%p239_p10) target bundleno = 818 (0x332), region = 44 }
  0x13   : > { %s1801_s15 = scalar_select %p169_p11, %s1672_s23, %s171_s14  }
  0x16   : > { %s269_s16 = sand.u32 1, %s1668_s22   ;;  %v1596_v0 = vld [vmem:[%s2645_s1] sm:$0xff]   ;;  %s1411_s20 = sshll.u32 %s1676_s24, 5  ;;  %vm349_vm0 = vcmask 130048  }
  0x17   : > { %s1809_s19 = sshll.u32 %s269_s16, 4  ;;  %1480 = vmatprep.subr.bf16.mxu0 %v1596_v0  ;;  %1514 = vmatprep.subr.bf16.mxu1 %v1596_v0  ;;  %p277_p12 = scmp.lt.s32.totalorder %s1411_s20, 37 }
  0x18   : > { %1481 = vmatpush3.bf16.msra.mxu0 %v1596_v0  ;;  %1515 = vmatpush3.bf16.msra.mxu1 %v1596_v0  ;;  %p559_p13 = scmp.eq.s32.totalorder %s1680_s25, 0  ;;  %p560_p0 = scmp.eq.s32.totalorder %s1676_s24, 0 }
  0x19   : > { %s2707_s20 = smov (!%p277_p12, %s1411_s20), 37  ;;  %s1938_s14 = scalar_lea.vmem [#allocation4], %s1809_s19 }
  0x1a   : > { %s1412_s29 = sshll.u32 %s2707_s20, 3  ;;  %p1869_p1 = pnand %p560_p0, %p559_p13 }
  0x1b   : > { %s1815_s12 = scalar_lea.vmem %s2644_s0, %s1412_s29 }
  0x1c   : > { %v293_v1 = vld [vmem:[%s1815_s12] sm:$0xff]  ;;  %v294_v2 = vld [vmem:[%s1815_s12 + $0x8] sm:$0xff]  ;;  %v295_v6 = vld [vmem:[%s1815_s12 + $0x10] sm:$0xff] }
  0x1d   : > { %v309_v3 = vld [vmem:[%s1815_s12 + $0x80] sm:$0xff]  ;;  %v325_v4 = vpack.c.bf16 %v294_v2, %v293_v1  ;;  %v310_v5 = vld [vmem:[%s1815_s12 + $0x88] sm:$0xff]  ;;  %v296_v7 = vld [vmem:[%s1815_s12 + $0x18] sm:$0xff] }
  0x1e   : > { %v333_v8 = vpack.c.bf16 %v310_v5, %v309_v3  ;;  %v326_v9 = vpack.c.bf16 %v296_v7, %v295_v6  ;;  %v311_v10 = vld [vmem:[%s1815_s12 + $0x90] sm:$0xff]  ;;  %v312_v11 = vld [vmem:[%s1815_s12 + $0x98] sm:$0xff]  ;;  %v297_v12 = vld [vmem:[%s1815_s12 + $0x20] sm:$0xff] }
  0x1f   : > { %1482 = vmatprep.mubr.msk.bf16.mxu0 %vm349_vm0, %v325_v4  ;;  %v334_v13 = vpack.c.bf16 %v312_v11, %v311_v10  ;;  %v298_v14 = vld [vmem:[%s1815_s12 + $0x28] sm:$0xff]  ;;  %v313_v15 = vld [vmem:[%s1815_s12 + $0xa0] sm:$0xff]  ;;  %v299_v19 = vld [vmem:[%s1815_s12 + $0x30] sm:$0xff] }
  0x20   : > { %v314_v16 = vld [vmem:[%s1815_s12 + $0xa8] sm:$0xff]  ;;  %1498 = vmatprep.mubr.msk.bf16.mxu1 %vm349_vm0, %v333_v8  ;;  %1483 = vmatmul.mubr.msk.bf16.vlgmr.msra.gmra.mxu0 %vm349_vm0, %v326_v9  ;;  %v327_v17 = vpack.c.bf16 %v298_v14, %v297_v12  ;;  %v300_v20 = vld [vmem:[%s1815_s12 + $0x38] sm:$0xff]  ;;  %v315_v21 = vld [vmem:[%s1815_s12 + $0xb0] sm:$0xff] }
  0x21   : > { %v335_v18 = vpack.c.bf16 %v314_v16, %v313_v15  ;;  %1499 = vmatmul.mubr.msk.bf16.vlgmr.msra.gmra.mxu1 %vm349_vm0, %v334_v13  ;;  %v316_v22 = vld [vmem:[%s1815_s12 + $0xb8] sm:$0xff]  ;;  %v301_v23 = vld [vmem:[%s1815_s12 + $0x40] sm:$0xff]  ;;  %v302_v24 = vld [vmem:[%s1815_s12 + $0x48] sm:$0xff]  ;;  %v328_v27 = vpack.c.bf16 %v300_v20, %v299_v19 }
  0x22   : > { %1486 = vmatprep.mubr.msk.bf16.mxu0 %vm349_vm0, %v327_v17  ;;  %v317_v25 = vld [vmem:[%s1815_s12 + $0xc0] sm:$0xff]  ;;  %v318_v26 = vld [vmem:[%s1815_s12 + $0xc8] sm:$0xff]  ;;  %v336_v28 = vpack.c.bf16 %v316_v22, %v315_v21  ;;  %v329_v29 = vpack.c.bf16 %v302_v24, %v301_v23  ;;  %v303_v31 = vld [vmem:[%s1815_s12 + $0x50] sm:$0xff] }
  0x23   : > { %1502 = vmatprep.mubr.msk.bf16.mxu1 %vm349_vm0, %v335_v18  ;;  %v337_v30 = vpack.c.bf16 %v318_v26, %v317_v25  ;;  %v304_v32 = vld [vmem:[%s1815_s12 + $0x58] sm:$0xff]  ;;  %v319_v33 = vld [vmem:[%s1815_s12 + $0xd0] sm:$0xff]  ;;  %v305_v35 = vld [vmem:[%s1815_s12 + $0x60] sm:$0xff] }
  0x24   : > { %v320_v34 = vld [vmem:[%s1815_s12 + $0xd8] sm:$0xff]  ;;  %v306_v36 = vld [vmem:[%s1815_s12 + $0x68] sm:$0xff]  ;;  %v321_v37 = vld [vmem:[%s1815_s12 + $0xe0] sm:$0xff]  ;;  %v330_v39 = vpack.c.bf16 %v304_v32, %v303_v31 }
  0x25   : > { %v322_v38 = vld [vmem:[%s1815_s12 + $0xe8] sm:$0xff]  ;;  %v338_v40 = vpack.c.bf16 %v320_v34, %v319_v33  ;;  %v331_v41 = vpack.c.bf16 %v306_v36, %v305_v35  ;;  %v307_v43 = vld [vmem:[%s1815_s12 + $0x70] sm:$0xff]  ;;  %v308_v44 = vld [vmem:[%s1815_s12 + $0x78] sm:$0xff] }
  0x26   : > { %v339_v42 = vpack.c.bf16 %v322_v38, %v321_v37  ;;  %v323_v45 = vld [vmem:[%s1815_s12 + $0xf0] sm:$0xff]  ;;  %v324_v46 = vld [vmem:[%s1815_s12 + $0xf8] sm:$0xff]  ;;  %v332_v47 = vpack.c.bf16 %v308_v44, %v307_v43 }
  0x27   : > { %v340_v48 = vpack.c.bf16 %v324_v46, %v323_v45 }
  0x28   : > { %1487 = vmatmul.mubr.msk.bf16.gmra.mxu0 %vm349_vm0, %v328_v27 }
  0x29   : > { %1503 = vmatmul.mubr.msk.bf16.gmra.mxu1 %vm349_vm0, %v336_v28  ;;  %1490 = vmatprep.mubr.msk.bf16.mxu0 %vm349_vm0, %v329_v29 }
  0x2a   : > { %1506 = vmatprep.mubr.msk.bf16.mxu1 %vm349_vm0, %v337_v30 }
  0x30   : > { %1491 = vmatmul.mubr.msk.bf16.gmra.mxu0 %vm349_vm0, %v330_v39 }
  0x31   : > { %1507 = vmatmul.mubr.msk.bf16.gmra.mxu1 %vm349_vm0, %v338_v40  ;;  %1494 = vmatprep.mubr.msk.bf16.mxu0 %vm349_vm0, %v331_v41 }
  0x32   : > { %1510 = vmatprep.mubr.msk.bf16.mxu1 %vm349_vm0, %v339_v42 }
  0x38   : > { %1495 = vmatmul.mubr.msk.bf16.gmra.mxu0 %vm349_vm0, %v332_v47 }
  0x39   : > { %1511 = vmatmul.mubr.msk.bf16.gmra.mxu1 %vm349_vm0, %v340_v48 }
  0xe0   : > { %v1873_v49 = vpop.f32.mrf.mxu0 }
  0xe1   : > { %2667 = vst [vmem:[#allocation7_spill] sm:$0xff] %v1873_v49  ;;  %v1875_v50 = vpop.f32.mrf.mxu1 }
  0xe2   : > { %v1877_v51 = vpop.f32.mrf.mxu0 }
  0xe3   : > { %2668 = vst [vmem:[#allocation8_spill] sm:$0xff] %v1877_v51  ;;  %v1879_v52 = vpop.f32.mrf.mxu1 }
  0xe4   : > { %v1881_v53 = vpop.f32.mrf.mxu0 }
  0xe5   : > { %2669 = vst [vmem:[#allocation9_spill] sm:$0xff] %v1881_v53  ;;  %v1883_v54 = vpop.f32.mrf.mxu1 }
  0xe6   : > { %v1885_v55 = vpop.f32.mrf.mxu0 }
  0xe7   : > { %2670 = vst [vmem:[#allocation10_spill] sm:$0xff] %v1885_v55  ;;  %v1887_v56 = vpop.f32.mrf.mxu1 }
  0xe8   : > { %v1889_v57 = vpop.f32.mrf.mxu0 }
  0xe9   : > { %2671 = vst [vmem:[#allocation11_spill] sm:$0xff] %v1889_v57  ;;  %v1891_v58 = vpop.f32.mrf.mxu1 }
  0xea   : > { %v1893_v59 = vpop.f32.mrf.mxu0 }
  0xeb   : > { %2672 = vst [vmem:[#allocation12_spill] sm:$0xff] %v1893_v59  ;;  %v1895_v60 = vpop.f32.mrf.mxu1 }
  0xec   : > { %v1897_v61 = vpop.f32.mrf.mxu0 }
  0xed   : > { %2673 = vst [vmem:[#allocation13_spill] sm:$0xff] %v1897_v61  ;;  %v1899_v62 = vpop.f32.mrf.mxu1 }
  0xee   : > { %v1901_v63 = vpop.f32.mrf.mxu0 }
  0xef   : > { %2674 = vst [vmem:[#allocation14_spill] sm:$0xff] %v1901_v63  ;;  %v1903_v0 = vpop.f32.mrf.mxu1 }
  0xf0   : > { %v1905_v1 = vpop.f32.mrf.mxu0 }
  0xf1   : > { %2675 = vst [vmem:[#allocation15_spill] sm:$0xff] %v1905_v1  ;;  %v1907_v2 = vpop.f32.mrf.mxu1 }
  0xf2   : > { %v1909_v3 = vpop.f32.mrf.mxu0 }
  0xf3   : > { %2676 = vst [vmem:[#allocation16_spill] sm:$0xff] %v1909_v3  ;;  %v1911_v4 = vpop.f32.mrf.mxu1 }
  0xf4   : > { %v1913_v5 = vpop.f32.mrf.mxu0 }
  0xf5   : > { %2677 = vst [vmem:[#allocation17_spill] sm:$0xff] %v1913_v5  ;;  %v1915_v6 = vpop.f32.mrf.mxu1 }
  0xf6   : > { %v1917_v7 = vpop.f32.mrf.mxu0 }
  0xf7   : > { %2678 = vst [vmem:[#allocation18_spill] sm:$0xff] %v1917_v7  ;;  %v1919_v8 = vpop.f32.mrf.mxu1 }
  0xf8   : > { %v1921_v9 = vpop.f32.mrf.mxu0 }
  0xf9   : > { %v1923_v10 = vpop.f32.mrf.mxu1 }
  0xfa   : > { %v1925_v11 = vpop.f32.mrf.mxu0 }
  0xfb   : > { %v1927_v12 = vpop.f32.mrf.mxu1  ;;  %564 = sbr.rel (%p1869_p1) target bundleno = 258 (0x102), region = 48 }
  0xfc   : > { %v1929_v13 = vpop.f32.mrf.mxu0 }
  0xfd   : > { %v1931_v14 = vpop.f32.mrf.mxu1 }
  0xfe   : > { %v1933_v15 = vpop.f32.mrf.mxu0 }
  0xff   : > { %2679 = vst [vmem:[#allocation19_spill] sm:$0xff] %v1933_v15  ;;  %v1935_v16 = vpop.f32.mrf.mxu1 }
 0x100   : > { %vm565_vm1 = vcmask 253952   ;;  %v1694_v17 = vmov 0.0  }
 0x101   : > { %566 = vst.msk [vmem:[#allocation2] sm:$0x1] %vm565_vm1, %v1694_v17  ;;  %567 = vst.msk [vmem:[#allocation3] sm:$0x1] %vm565_vm1, %v1694_v17 }
 0x102 PF: > { %p568_p2 = scmp.lt.s32.totalorder %s1676_s24, 1 }
 0x104   : > { %p569_p3 = pnand %p568_p2, %p559_p13 }
 0x106   : > { %572 = sbr.rel (%p569_p3) target bundleno = 354 (0x162), region = 52 }
 0x10b   : > { %vm574_vm2 = vcmask 261120   ;;  %v648_v34 = vmul.f32 %v1877_v51, %v1877_v51  ;;  %v649_v36 = vmul.f32 %v1885_v55, %v1885_v55  ;;  %v650_v37 = vmul.f32 %v1873_v49, %v1873_v49 }
 0x10c   : > { %v575_v18 = vsel %vm574_vm2, %v1877_v51, 0.0  ;;  %v576_v19 = vsel %vm574_vm2, %v1885_v55, 0.0  ;;  %v578_v20 = vsel %vm574_vm2, %v1873_v49, 0.0  ;;  %v580_v22 = vsel %vm574_vm2, %v1881_v53, 0.0 }
 0x10d   : > { %v577_v21 = vadd.f32 %v576_v19, %v575_v18  ;;  %v582_v24 = vsel %vm574_vm2, %v1893_v59, 0.0  ;;  %v584_v26 = vsel %vm574_vm2, %v1901_v63, 0.0  ;;  %v586_v28 = vsel %vm574_vm2, %v1889_v57, 0.0 }
 0x10e   : > { %v588_v30 = vsel %vm574_vm2, %v1897_v61, 0.0  ;;  %v590_v32 = vsel %vm574_vm2, %v1909_v3, 0.0  ;;  %v592_v35 = vsel %vm574_vm2, %v1917_v7, 0.0  ;;  %v594_v39 = vsel %vm574_vm2, %v1905_v1, 0.0 }
 0x10f   : > { %v579_v23 = vadd.f32 %v578_v20, %v577_v21  ;;  %v651_v40 = vmul.f32 %v1881_v53, %v1881_v53  ;;  %v680_v42 = vsel %vm574_vm2, %v648_v34, 0.0  ;;  %v596_v43 = vsel %vm574_vm2, %v1913_v5, 0.0 }
 0x110   : > { %v652_v44 = vmul.f32 %v1893_v59, %v1893_v59  ;;  %v681_v45 = vsel %vm574_vm2, %v649_v36, 0.0  ;;  %v683_v46 = vsel %vm574_vm2, %v650_v37, 0.0  ;;  %v598_v17 = vsel %vm574_vm2, %v1925_v11, 0.0 }
 0x111   : > { %v581_v25 = vadd.f32 %v580_v22, %v579_v23  ;;  %v682_v48 = vadd.f32 %v681_v45, %v680_v42  ;;  %v653_v18 = vmul.f32 %v1901_v63, %v1901_v63  ;;  %v685_v19 = vsel %vm574_vm2, %v651_v40, 0.0 }
 0x112   : > { %v600_v22 = vsel %vm574_vm2, %v1933_v15, 0.0  ;;  %v654_v23 = vmul.f32 %v1889_v57, %v1889_v57  ;;  %v606_v37 = vsel %vm574_vm2, %v1879_v52, 0.0  ;;  %v608_v42 = vsel %vm574_vm2, %v1887_v56, 0.0 }
 0x113   : > { %v583_v27 = vadd.f32 %v582_v24, %v581_v25  ;;  %v684_v21 = vadd.f32 %v683_v46, %v682_v48  ;;  %v687_v24 = vsel %vm574_vm2, %v652_v44, 0.0  ;;  %v659_v48 = vmul.f32 %v1913_v5, %v1913_v5 }
 0x114   : > { %v691_v34 = vsel %vm574_vm2, %v654_v23, 0.0  ;;  %vm645_vm3 = vcmask 253952  }
 0x115   : > { %v585_v29 = vadd.f32 %v584_v26, %v583_v27  ;;  %v686_v26 = vadd.f32 %v685_v19, %v684_v21  ;;  %v602_v27 = vsel %vm574_vm2, %v1921_v9, 0.0  ;;  %v660_v21 = vmul.f32 %v1925_v11, %v1925_v11 }
 0x117   : > { %v587_v31 = vadd.f32 %v586_v28, %v585_v29  ;;  %v655_v28 = vmul.f32 %v1897_v61, %v1897_v61  ;;  %v689_v29 = vsel %vm574_vm2, %v653_v18, 0.0 }
 0x119   : > { %v589_v33 = vadd.f32 %v588_v30, %v587_v31  ;;  %v688_v31 = vadd.f32 %v687_v24, %v686_v26  ;;  %v661_v26 = vmul.f32 %v1933_v15, %v1933_v15 }
 0x11b   : > { %v591_v38 = vadd.f32 %v590_v32, %v589_v33  ;;  %v604_v32 = vsel %vm574_vm2, %v1929_v13, 0.0  ;;  %v656_v33 = vmul.f32 %v1909_v3, %v1909_v3  ;;  %v690_v36 = vadd.f32 %v689_v29, %v688_v31 }
 0x11c   : > { %v662_v31 = vmul.f32 %v1921_v9, %v1921_v9 }
 0x11d   : > { %v593_v41 = vadd.f32 %v592_v35, %v591_v38  ;;  %v657_v38 = vmul.f32 %v1917_v7, %v1917_v7  ;;  %v695_v44 = vsel %vm574_vm2, %v656_v33, 0.0 }
 0x11f   : > { %v595_v47 = vadd.f32 %v594_v39, %v593_v41  ;;  %v693_v39 = vsel %vm574_vm2, %v655_v28, 0.0  ;;  %v692_v41 = vadd.f32 %v691_v34, %v690_v36  ;;  %v663_v36 = vmul.f32 %v1929_v13, %v1929_v13 }
 0x121   : > { %v597_v20 = vadd.f32 %v596_v43, %v595_v47  ;;  %v658_v43 = vmul.f32 %v1905_v1, %v1905_v1  ;;  %v694_v46 = vadd.f32 %v693_v39, %v692_v41  ;;  %v610_v47 = vsel %vm574_vm2, %v1875_v50, 0.0 }
 0x122   : > { %v664_v41 = vmul.f32 %v1879_v52, %v1879_v52 }
 0x123   : > { %v599_v25 = vadd.f32 %v598_v17, %v597_v20  ;;  %v697_v17 = vsel %vm574_vm2, %v657_v38, 0.0  ;;  %v696_v19 = vadd.f32 %v695_v44, %v694_v46  ;;  %v612_v20 = vsel %vm574_vm2, %v1883_v54, 0.0 }
 0x124   : > { %v665_v46 = vmul.f32 %v1887_v56, %v1887_v56 }
 0x125   : > { %v601_v30 = vadd.f32 %v600_v22, %v599_v25  ;;  %v699_v22 = vsel %vm574_vm2, %v658_v43, 0.0  ;;  %v698_v24 = vadd.f32 %v697_v17, %v696_v19  ;;  %v614_v25 = vsel %vm574_vm2, %v1895_v60, 0.0 }
 0x126   : > { %v666_v19 = vmul.f32 %v1875_v50, %v1875_v50 }
 0x127   : > { %v603_v35 = vadd.f32 %v602_v27, %v601_v30  ;;  %v701_v27 = vsel %vm574_vm2, %v659_v48, 0.0  ;;  %v700_v29 = vadd.f32 %v699_v22, %v698_v24  ;;  %v616_v30 = vsel %vm574_vm2, %v1903_v0, 0.0 }
 0x128   : > { %v667_v24 = vmul.f32 %v1883_v54, %v1883_v54 }
 0x129   : > { %v605_v40 = vadd.f32 %v604_v32, %v603_v35  ;;  %v703_v32 = vsel %vm574_vm2, %v660_v21, 0.0  ;;  %v702_v34 = vadd.f32 %v701_v27, %v700_v29  ;;  %v618_v35 = vsel %vm574_vm2, %v1891_v58, 0.0 }
 0x12a   : > { %v668_v29 = vmul.f32 %v1895_v60, %v1895_v60 }
 0x12b   : > { %v607_v45 = vadd.f32 %v606_v37, %v605_v40  ;;  %v705_v37 = vsel %vm574_vm2, %v661_v26, 0.0  ;;  %v704_v39 = vadd.f32 %v703_v32, %v702_v34  ;;  %v620_v40 = vsel %vm574_vm2, %v1899_v62, 0.0 }
 0x12c   : > { %v669_v34 = vmul.f32 %v1903_v0, %v1903_v0 }
 0x12d   : > { %v609_v18 = vadd.f32 %v608_v42, %v607_v45  ;;  %v707_v42 = vsel %vm574_vm2, %v662_v31, 0.0  ;;  %v706_v44 = vadd.f32 %v705_v37, %v704_v39  ;;  %v622_v45 = vsel %vm574_vm2, %v1911_v4, 0.0 }
 0x12e   : > { %v670_v39 = vmul.f32 %v1891_v58, %v1891_v58 }
 0x12f   : > { %v611_v23 = vadd.f32 %v610_v47, %v609_v18  ;;  %v709_v47 = vsel %vm574_vm2, %v663_v36, 0.0  ;;  %v708_v17 = vadd.f32 %v707_v42, %v706_v44  ;;  %v624_v18 = vsel %vm574_vm2, %v1919_v8, 0.0 }
 0x130   : > { %v671_v44 = vmul.f32 %v1899_v62, %v1899_v62 }
 0x131   : > { %v613_v28 = vadd.f32 %v612_v20, %v611_v23  ;;  %v711_v20 = vsel %vm574_vm2, %v664_v41, 0.0  ;;  %v710_v22 = vadd.f32 %v709_v47, %v708_v17  ;;  %v626_v23 = vsel %vm574_vm2, %v1907_v2, 0.0 }
 0x132   : > { %v672_v17 = vmul.f32 %v1911_v4, %v1911_v4 }
 0x133   : > { %v615_v33 = vadd.f32 %v614_v25, %v613_v28  ;;  %v713_v25 = vsel %vm574_vm2, %v665_v46, 0.0  ;;  %v712_v27 = vadd.f32 %v711_v20, %v710_v22  ;;  %v628_v28 = vsel %vm574_vm2, %v1915_v6, 0.0 }
 0x134   : > { %v725_v22 = vsel %vm574_vm2, %v671_v44, 0.0 }
 0x135   : > { %v617_v38 = vadd.f32 %v616_v30, %v615_v33  ;;  %v715_v30 = vsel %vm574_vm2, %v666_v19, 0.0  ;;  %v714_v32 = vadd.f32 %v713_v25, %v712_v27  ;;  %v630_v33 = vsel %vm574_vm2, %v1927_v12, 0.0 }
 0x136   : > { %v674_v25 = vmul.f32 %v1907_v2, %v1907_v2 }
 0x137   : > { %v619_v43 = vadd.f32 %v618_v35, %v617_v38  ;;  %v717_v35 = vsel %vm574_vm2, %v667_v24, 0.0  ;;  %v716_v37 = vadd.f32 %v715_v30, %v714_v32  ;;  %v632_v38 = vsel %vm574_vm2, %v1935_v16, 0.0 }
 0x139   : > { %v621_v48 = vadd.f32 %v620_v40, %v619_v43  ;;  %v719_v40 = vsel %vm574_vm2, %v668_v29, 0.0  ;;  %v718_v42 = vadd.f32 %v717_v35, %v716_v37  ;;  %v634_v43 = vsel %vm574_vm2, %v1923_v10, 0.0 }
 0x13a   : > { %v675_v29 = vmul.f32 %v1915_v6, %v1915_v6  ;;  %v677_v37 = vmul.f32 %v1935_v16, %v1935_v16 }
 0x13b   : > { %v623_v21 = vadd.f32 %v622_v45, %v621_v48  ;;  %v721_v45 = vsel %vm574_vm2, %v669_v34, 0.0  ;;  %v720_v47 = vadd.f32 %v719_v40, %v718_v42  ;;  %v636_v48 = vsel %vm574_vm2, %v1931_v14, 0.0 }
 0x13c   : > { %v731_v34 = vsel %vm574_vm2, %v674_v25, 0.0 }
 0x13d   : > { %v625_v26 = vadd.f32 %v624_v18, %v623_v21  ;;  %v723_v18 = vsel %vm574_vm2, %v670_v39, 0.0  ;;  %v722_v20 = vadd.f32 %v721_v45, %v720_v47  ;;  %v673_v21 = vmul.f32 %v1919_v8, %v1919_v8  ;;  %v573_v45 = vld [vmem:[#allocation2] sm:$0x1] }
 0x13e   : > { %v737_v47 = vsel %vm574_vm2, %v677_v37, 0.0 }
 0x13f   : > { %v627_v31 = vadd.f32 %v626_v23, %v625_v26  ;;  %v724_v24 = vadd.f32 %v723_v18, %v722_v20  ;;  %v727_v26 = vsel %vm574_vm2, %v672_v17, 0.0  ;;  %v729_v30 = vsel %vm574_vm2, %v673_v21, 0.0 }
 0x141   : > { %v629_v36 = vadd.f32 %v628_v28, %v627_v31  ;;  %v726_v28 = vadd.f32 %v725_v22, %v724_v24 }
 0x143   : > { %v631_v41 = vadd.f32 %v630_v33, %v629_v36  ;;  %v728_v32 = vadd.f32 %v727_v26, %v726_v28  ;;  %v676_v33 = vmul.f32 %v1927_v12, %v1927_v12 }
 0x145   : > { %v633_v46 = vadd.f32 %v632_v38, %v631_v41  ;;  %v730_v36 = vadd.f32 %v729_v30, %v728_v32  ;;  %v733_v38 = vsel %vm574_vm2, %v675_v29, 0.0  ;;  %v678_v41 = vmul.f32 %v1923_v10, %v1923_v10  ;;  %v647_v29 = vld [vmem:[#allocation3] sm:$0x1] }
 0x146   : > { %v735_v42 = vsel %vm574_vm2, %v676_v33, 0.0 }
 0x147   : > { %v635_v19 = vadd.f32 %v634_v43, %v633_v46  ;;  %v732_v40 = vadd.f32 %v731_v34, %v730_v36  ;;  %v679_v46 = vmul.f32 %v1931_v14, %v1931_v14  ;;  %v739_v18 = vsel %vm574_vm2, %v678_v41, 0.0 }
 0x149   : > { %v637_v23 = vadd.f32 %v636_v48, %v635_v19  ;;  %v734_v44 = vadd.f32 %v733_v38, %v732_v40  ;;  %v741_v21 = vsel %vm574_vm2, %v679_v46, 0.0 }
 0x14b   : > { %v638_v27 = vrot.slane %v637_v23, 4  ;;  %v736_v17 = vadd.f32 %v735_v42, %v734_v44 }
 0x14d   : > { %v639_v31 = vadd.f32 %v638_v27, %v637_v23  ;;  %v738_v20 = vadd.f32 %v737_v47, %v736_v17 }
 0x14f   : > { %v640_v35 = vrot.slane %v639_v31, 2  ;;  %v740_v22 = vadd.f32 %v739_v18, %v738_v20 }
 0x151   : > { %v641_v39 = vadd.f32 %v640_v35, %v639_v31  ;;  %v742_v23 = vadd.f32 %v741_v21, %v740_v22 }
 0x153   : > { %v642_v43 = vrot.slane %v641_v39, 1  ;;  %v743_v24 = vrot.slane %v742_v23, 4 }
 0x155   : > { %v643_v48 = vadd.f32 %v642_v43, %v641_v39  ;;  %v744_v25 = vadd.f32 %v743_v24, %v742_v23 }
 0x157   : > { %v644_v19 = vadd.f32 %v643_v48, %v573_v45  ;;  %v745_v26 = vrot.slane %v744_v25, 2 }
 0x159   : > { %646 = vst.msk [vmem:[#allocation2] sm:$0x1] %vm645_vm3, %v644_v19  ;;  %v746_v27 = vadd.f32 %v745_v26, %v744_v25 }
 0x15b   : > { %v747_v28 = vrot.slane %v746_v27, 1 }
 0x15d   : > { %v748_v30 = vadd.f32 %v747_v28, %v746_v27 }
 0x15f   : > { %v749_v31 = vadd.f32 %v748_v30, %v647_v29 }
 0x161   : > { %750 = vst.msk [vmem:[#allocation3] sm:$0x1] %vm645_vm3, %v749_v31 }
 0x162 PF: > { %p751_p4 = scmp.eq.s32.totalorder %s1676_s24, 1 }
 0x164   : > { %p752_p5 = pnand %p751_p4, %p559_p13 }
 0x165   : > { %s1430_s17 = sshll.u32 (!%p752_p5), %s1676_s24, 8 }
 0x166   : > { %755 = sbr.rel (%p752_p5) target bundleno = 506 (0x1fa), region = 56 }
 0x16b   : > { %v757_v32 = vlaneseq  ;;  %v2115_v36 = vstv %s1430_s17  ;;  %vm888_vm7 = vcmask 261120  }
 0x16d   : > { %v2110_v33 = vshrl.u32 %v757_v32, 7 }
 0x16f   : > { %v759_v34 = vadd.s32 8, %v2110_v33  ;;  %v760_v35 = vadd.s32 16, %v2110_v33  ;;  %v761_v37 = vadd.s32 24, %v2110_v33  ;;  %v791_v38 = vadd.s32 %v2115_v36, %v2110_v33 }
 0x170   : > { %v762_v39 = vadd.s32 32, %v2110_v33  ;;  %v763_v42 = vadd.s32 40, %v2110_v33  ;;  %v764_v44 = vadd.s32 48, %v2110_v33  ;;  %v765_v46 = vadd.s32 56, %v2110_v33 }
 0x171   : > { %v792_v40 = vadd.s32 %v2115_v36, %v759_v34  ;;  %v793_v41 = vadd.s32 %v2115_v36, %v760_v35  ;;  %v794_v43 = vadd.s32 %v2115_v36, %v761_v37  ;;  %vm823_vm4 = vcmp.lt.s32.totalorder %v791_v38, 300 }
 0x172   : > { %v795_v45 = vadd.s32 %v2115_v36, %v762_v39  ;;  %v796_v47 = vadd.s32 %v2115_v36, %v763_v42  ;;  %v2130_v48 = vsel %vm823_vm4, %v1877_v51, 0.0  ;;  %v766_v17 = vadd.s32 64, %v2110_v33 }
 0x173   : > { %vm824_vm5 = vcmp.lt.s32.totalorder %v792_v40, 300  ;;  %vm825_vm6 = vcmp.lt.s32.totalorder %v793_v41, 300  ;;  %vm826_vm8 = vcmp.lt.s32.totalorder %v794_v43, 300  ;;  %v767_v20 = vadd.s32 72, %v2110_v33 }
 0x174   : > { %v2134_v18 = vsel %vm824_vm5, %v1885_v55, 0.0  ;;  %v2137_v19 = vsel %vm825_vm6, %v1873_v49, 0.0  ;;  %v768_v21 = vadd.s32 80, %v2110_v33  ;;  %v797_v22 = vadd.s32 %v2115_v36, %v764_v44 }
 0x175   : > { %vm827_vm9 = vcmp.lt.s32.totalorder %v795_v45, 300  ;;  %v769_v23 = vadd.s32 88, %v2110_v33  ;;  %v770_v24 = vadd.s32 96, %v2110_v33  ;;  %v2145_v25 = vsel %vm826_vm8, %v1881_v53, 0.0 }
 0x176   : > { %v889_v26 = vsel %vm888_vm7, %v2130_v48, 0.0  ;;  %v798_v27 = vadd.s32 %v2115_v36, %v765_v46  ;;  %vm828_vm10 = vcmp.lt.s32.totalorder %v796_v47, 300  ;;  %v890_v28 = vsel %vm888_vm7, %v2134_v18, 0.0 }
 0x177   : > { %v892_v29 = vsel %vm888_vm7, %v2137_v19, 0.0  ;;  %v771_v30 = vadd.s32 104, %v2110_v33  ;;  %v772_v31 = vadd.s32 112, %v2110_v33  ;;  %v2157_v32 = vsel %vm827_vm9, %v1893_v59, 0.0 }
 0x178   : > { %v891_v34 = vadd.f32 %v890_v28, %v889_v26  ;;  %v773_v35 = vadd.s32 120, %v2110_v33  ;;  %v799_v37 = vadd.s32 %v2115_v36, %v766_v17  ;;  %vm829_vm11 = vcmp.lt.s32.totalorder %v797_v22, 300 }
 0x179   : > { %v894_v38 = vsel %vm888_vm7, %v2145_v25, 0.0  ;;  %v774_v39 = vadd.s32 128, %v2110_v33  ;;  %v2165_v40 = vadd.s32 136, %v2110_v33  ;;  %v2168_v41 = vsel %vm828_vm10, %v1901_v63, 0.0 }
 0x17a   : > { %v893_v42 = vadd.f32 %v892_v29, %v891_v34  ;;  %v2171_v43 = vadd.s32 144, %v2110_v33  ;;  %v800_v44 = vadd.s32 %v2115_v36, %v767_v20  ;;  %vm830_vm12 = vcmp.lt.s32.totalorder %v798_v27, 300 }
 0x17b   : > { %v896_v45 = vsel %vm888_vm7, %v2157_v32, 0.0  ;;  %v2177_v46 = vadd.s32 152, %v2110_v33  ;;  %v2180_v47 = vadd.s32 160, %v2110_v33  ;;  %v2183_v17 = vsel %vm829_vm11, %v1889_v57, 0.0 }
 0x17c   : > { %v895_v22 = vadd.f32 %v894_v38, %v893_v42  ;;  %v801_v26 = vadd.s32 %v2115_v36, %v768_v21  ;;  %v802_v28 = vadd.s32 %v2115_v36, %v769_v23  ;;  %vm831_vm13 = vcmp.lt.s32.totalorder %v799_v37, 300 }
 0x17d   : > { %v898_v20 = vsel %vm888_vm7, %v2168_v41, 0.0  ;;  %v2190_v27 = vadd.s32 168, %v2110_v33  ;;  %v2193_v29 = vadd.s32 176, %v2110_v33  ;;  %v2196_v34 = vsel %vm830_vm12, %v1897_v61, 0.0 }
 0x17e   : > { %v897_v55 = vadd.f32 %v896_v45, %v895_v22  ;;  %v2199_v38 = vadd.s32 184, %v2110_v33  ;;  %v2202_v21 = vadd.s32 192, %v2110_v33  ;;  %vm832_vm14 = vcmp.lt.s32.totalorder %v800_v44, 300 }
 0x17f   : > { %v900_v23 = vsel %vm888_vm7, %v2183_v17, 0.0  ;;  %v2207_v37 = vadd.s32 200, %v2110_v33  ;;  %v803_v42 = vadd.s32 %v2115_v36, %v770_v24  ;;  %v2211_v51 = vsel %vm831_vm13, %v1909_v3, 0.0 }
 0x180   : > { %v899_v53 = vadd.f32 %v898_v20, %v897_v55  ;;  %v2214_v45 = vadd.s32 208, %v2110_v33  ;;  %vm833_vm15 = vcmp.lt.s32.totalorder %v801_v26, 300  ;;  %vm834_vm0 = vcmp.lt.s32.totalorder %v802_v28, 300 }
 0x181   : > { %v902_v44 = vsel %vm888_vm7, %v2196_v34, 0.0  ;;  %v2219_v22 = vadd.s32 216, %v2110_v33  ;;  %v2222_v49 = vadd.s32 224, %v2110_v33  ;;  %v2225_v24 = vsel %vm832_vm14, %v1917_v7, 0.0 }
 0x182   : > { %v901_v63 = vadd.f32 %v900_v23, %v899_v53  ;;  %v2228_v55 = vadd.s32 232, %v2110_v33  ;;  %v804_v20 = vadd.s32 %v2115_v36, %v771_v30  ;;  %v805_v26 = vadd.s32 %v2115_v36, %v772_v31 }
 0x183   : > { %v904_v28 = vsel %vm888_vm7, %v2211_v51, 0.0  ;;  %vm835_vm1 = vcmp.lt.s32.totalorder %v803_v42, 300  ;;  %v2235_v59 = vsel %vm833_vm15, %v1905_v1, 0.0  ;;  %v2238_v61 = vsel %vm834_vm0, %v1913_v5, 0.0 }
 0x184   : > { %v903_v57 = vadd.f32 %v902_v44, %v901_v63  ;;  %v906_v53 = vsel %vm888_vm7, %v2225_v24, 0.0  ;;  %v962_v23 = vmul.f32 %v2130_v48, %v2130_v48  ;;  %v963_v30 = vmul.f32 %v2134_v18, %v2134_v18 }
 0x185   : > { %v964_v31 = vmul.f32 %v2137_v19, %v2137_v19  ;;  %v2249_v7 = vadd.s32 240, %v2110_v33  ;;  %v2252_v3 = vadd.s32 248, %v2110_v33  ;;  %v806_v63 = vadd.s32 %v2115_v36, %v773_v35 }
 0x186   : > { %v905_v44 = vadd.f32 %v904_v28, %v903_v57  ;;  %v807_v5 = vadd.s32 %v2115_v36, %v774_v39  ;;  %vm836_vm2 = vcmp.lt.s32.totalorder %v804_v20, 300  ;;  %v908_v48 = vsel %vm888_vm7, %v2235_v59, 0.0 }
 0x187   : > { %v965_v18 = vmul.f32 %v2145_v25, %v2145_v25  ;;  %vm837_vm3 = vcmp.lt.s32.totalorder %v805_v26, 300  ;;  %v2262_v19 = vsel %vm835_vm1, %v1925_v11, 0.0  ;;  %v910_v33 = vsel %vm888_vm7, %v2238_v61, 0.0 }
 0x188   : > { %v907_v1 = vadd.f32 %v906_v53, %v905_v44  ;;  %v966_v57 = vmul.f32 %v2157_v32, %v2157_v32  ;;  %v994_v35 = vsel %vm888_vm7, %v962_v23, 0.0  ;;  %v995_v39 = vsel %vm888_vm7, %v963_v30, 0.0 }
 0x189   : > { %v997_v20 = vsel %vm888_vm7, %v964_v31, 0.0  ;;  %v808_v25 = vadd.s32 %v2115_v36, %v2165_v40  ;;  %v2274_v42 = vsel %vm836_vm2, %v1933_v15, 0.0  ;;  %v996_v53 = vadd.f32 %v995_v39, %v994_v35 }
 0x18a   : > { %v909_v28 = vadd.f32 %v908_v48, %v907_v1  ;;  %vm838_vm4 = vcmp.lt.s32.totalorder %v806_v63, 300  ;;  %v912_v44 = vsel %vm888_vm7, %v2262_v19, 0.0  ;;  %v967_v32 = vmul.f32 %v2168_v41, %v2168_v41 }
 0x18b   : > { %v999_v23 = vsel %vm888_vm7, %v965_v18, 0.0  ;;  %v809_v30 = vadd.s32 %v2115_v36, %v2171_v43  ;;  %v2285_v40 = vsel %vm837_vm3, %v1921_v9, 0.0  ;;  %v998_v15 = vadd.f32 %v997_v20, %v996_v53 }
 0x18c   : > { %v911_v31 = vadd.f32 %v910_v33, %v909_v28  ;;  %vm839_vm5 = vcmp.lt.s32.totalorder %v807_v5, 300  ;;  %v914_v1 = vsel %vm888_vm7, %v2274_v42, 0.0  ;;  %v968_v63 = vmul.f32 %v2183_v17, %v2183_v17 }
 0x18d   : > { %v1001_v41 = vsel %vm888_vm7, %v966_v57, 0.0  ;;  %v810_v48 = vadd.s32 %v2115_v36, %v2177_v46  ;;  %v2295_v43 = vsel %vm838_vm4, %v1929_v13, 0.0  ;;  %v1000_v18 = vadd.f32 %v999_v23, %v998_v15 }
 0x18e   : > { %v913_v26 = vadd.f32 %v912_v44, %v911_v31  ;;  %vm840_vm6 = vcmp.lt.s32.totalorder %v808_v25, 300  ;;  %v916_v5 = vsel %vm888_vm7, %v2285_v40, 0.0  ;;  %v969_v33 = vmul.f32 %v2196_v34, %v2196_v34 }
 0x18f   : > { %v1003_v35 = vsel %vm888_vm7, %v967_v32, 0.0  ;;  %v811_v17 = vadd.s32 %v2115_v36, %v2180_v47  ;;  %v2305_v57 = vsel %vm839_vm5, %v1879_v52, 0.0  ;;  %v1002_v39 = vadd.f32 %v1001_v41, %v1000_v18 }
 0x190   : > { %v915_v46 = vadd.f32 %v914_v1, %v913_v26  ;;  %vm841_vm8 = vcmp.lt.s32.totalorder %v809_v30, 300  ;;  %v918_v15 = vsel %vm888_vm7, %v2295_v43, 0.0  ;;  %v970_v20 = vmul.f32 %v2211_v51, %v2211_v51 }
 0x191   : > { %v1005_v25 = vsel %vm888_vm7, %v968_v63, 0.0  ;;  %v812_v34 = vadd.s32 %v2115_v36, %v2190_v27  ;;  %v2315_v28 = vsel %vm840_vm6, %v1887_v56, 0.0  ;;  %v1004_v53 = vadd.f32 %v1003_v35, %v1002_v39 }
 0x192   : > { %v917_v47 = vadd.f32 %v916_v5, %v915_v46  ;;  %vm842_vm9 = vcmp.lt.s32.totalorder %v810_v48, 300  ;;  %v920_v44 = vsel %vm888_vm7, %v2305_v57, 0.0  ;;  %v971_v32 = vmul.f32 %v2225_v24, %v2225_v24 }
 0x193   : > { %v1007_v23 = vsel %vm888_vm7, %v969_v33, 0.0  ;;  %v813_v51 = vadd.s32 %v2115_v36, %v2193_v29  ;;  %v2325_v30 = vsel %vm841_vm8, %v1875_v50, 0.0  ;;  %v1006_v31 = vadd.f32 %v1005_v25, %v1004_v53 }
 0x194   : > { %v919_v27 = vadd.f32 %v918_v15, %v917_v47  ;;  %vm843_vm10 = vcmp.lt.s32.totalorder %v811_v17, 300  ;;  %v922_v1 = vsel %vm888_vm7, %v2315_v28, 0.0  ;;  %v972_v63 = vmul.f32 %v2235_v59, %v2235_v59 }
 0x195   : > { %v1009_v41 = vsel %vm888_vm7, %v970_v20, 0.0  ;;  %v814_v24 = vadd.s32 %v2115_v36, %v2199_v38  ;;  %v2335_v48 = vsel %vm842_vm9, %v1883_v54, 0.0  ;;  %v1008_v26 = vadd.f32 %v1007_v23, %v1006_v31 }
 0x196   : > { %v921_v29 = vadd.f32 %v920_v44, %v919_v27  ;;  %vm844_vm11 = vcmp.lt.s32.totalorder %v812_v34, 300  ;;  %v924_v18 = vsel %vm888_vm7, %v2325_v30, 0.0  ;;  %v973_v5 = vmul.f32 %v2238_v61, %v2238_v61 }
 0x197   : > { %v1011_v33 = vsel %vm888_vm7, %v971_v32, 0.0  ;;  %v815_v59 = vadd.s32 %v2115_v36, %v2202_v21  ;;  %v2345_v35 = vsel %vm843_vm10, %v1895_v60, 0.0  ;;  %v1010_v17 = vadd.f32 %v1009_v41, %v1008_v26 }
 0x198   : > { %v923_v38 = vadd.f32 %v922_v1, %v921_v29  ;;  %vm845_vm12 = vcmp.lt.s32.totalorder %v813_v51, 300  ;;  %v926_v46 = vsel %vm888_vm7, %v2335_v48, 0.0  ;;  %v974_v39 = vmul.f32 %v2262_v19, %v2262_v19 }
 0x199   : > { %v1013_v15 = vsel %vm888_vm7, %v972_v63, 0.0  ;;  %v816_v61 = vadd.s32 %v2115_v36, %v2207_v37  ;;  %v2355_v20 = vsel %vm844_vm11, %v1903_v0, 0.0  ;;  %v1012_v25 = vadd.f32 %v1011_v33, %v1010_v17 }
 0x19a   : > { %v925_v21 = vadd.f32 %v924_v18, %v923_v38  ;;  %vm846_vm13 = vcmp.lt.s32.totalorder %v814_v24, 300  ;;  %v928_v34 = vsel %vm888_vm7, %v2345_v35, 0.0  ;;  %v975_v47 = vmul.f32 %v2274_v42, %v2274_v42 }
 0x19b   : > { %v1015_v53 = vsel %vm888_vm7, %v973_v5, 0.0  ;;  %v817_v19 = vadd.s32 %v2115_v36, %v2214_v45  ;;  %v2365_v44 = vsel %vm845_vm12, %v1891_v58, 0.0  ;;  %v1014_v32 = vadd.f32 %v1013_v15, %v1012_v25 }
 0x19c   : > { %v927_v37 = vadd.f32 %v926_v46, %v925_v21  ;;  %vm847_vm14 = vcmp.lt.s32.totalorder %v815_v59, 300  ;;  %v930_v23 = vsel %vm888_vm7, %v2355_v20, 0.0  ;;  %v976_v51 = vmul.f32 %v2285_v40, %v2285_v40 }
 0x19d   : > { %v1017_v27 = vsel %vm888_vm7, %v974_v39, 0.0  ;;  %v818_v42 = vadd.s32 %v2115_v36, %v2219_v22  ;;  %v2375_v31 = vsel %vm846_vm13, %v1899_v62, 0.0  ;;  %v1016_v1 = vadd.f32 %v1015_v53, %v1014_v32 }
 0x19e   : > { %v929_v45 = vadd.f32 %v928_v34, %v927_v37  ;;  %vm848_vm15 = vcmp.lt.s32.totalorder %v816_v61, 300  ;;  %v932_v63 = vsel %vm888_vm7, %v2365_v44, 0.0  ;;  %v977_v41 = vmul.f32 %v2295_v43, %v2295_v43 }
 0x19f   : > { %v1019_v24 = vsel %vm888_vm7, %v975_v47, 0.0  ;;  %v819_v40 = vadd.s32 %v2115_v36, %v2222_v49  ;;  %v879_v29 = vsel %vm847_vm14, %v1911_v4, 0.0  ;;  %v1018_v26 = vadd.f32 %v1017_v27, %v1016_v1 }
 0x1a0   : > { %v931_v22 = vadd.f32 %v930_v23, %v929_v45  ;;  %vm849_vm0 = vcmp.lt.s32.totalorder %v817_v19, 300  ;;  %v934_v18 = vsel %vm888_vm7, %v2375_v31, 0.0  ;;  %v978_v5 = vmul.f32 %v2305_v57, %v2305_v57 }
 0x1a1   : > { %v1021_v33 = vsel %vm888_vm7, %v976_v51, 0.0  ;;  %v820_v43 = vadd.s32 %v2115_v36, %v2228_v55  ;;  %v880_v59 = vsel %vm848_vm15, %v1919_v8, 0.0  ;;  %v1020_v49 = vadd.f32 %v1019_v24, %v1018_v26 }
 0x1a2   : > { %v933_v38 = vadd.f32 %v932_v63, %v931_v22  ;;  %vm850_vm1 = vcmp.lt.s32.totalorder %v818_v42, 300  ;;  %v936_v17 = vsel %vm888_vm7, %v879_v29, 0.0  ;;  %v979_v46 = vmul.f32 %v2315_v28, %v2315_v28 }
 0x1a3   : > { %v1023_v39 = vsel %vm888_vm7, %v977_v41, 0.0  ;;  %v821_v57 = vadd.s32 %v2115_v36, %v2249_v7  ;;  %v881_v15 = vsel %vm849_vm0, %v1907_v2, 0.0  ;;  %v1022_v21 = vadd.f32 %v1021_v33, %v1020_v49 }
 0x1a4   : > { %v935_v61 = vadd.f32 %v934_v18, %v933_v38  ;;  %vm851_vm2 = vcmp.lt.s32.totalorder %v819_v40, 300  ;;  %v938_v55 = vsel %vm888_vm7, %v880_v59, 0.0  ;;  %v980_v25 = vmul.f32 %v2325_v30, %v2325_v30 }
 0x1a5   : > { %v1025_v34 = vsel %vm888_vm7, %v978_v5, 0.0  ;;  %v822_v28 = vadd.s32 %v2115_v36, %v2252_v3  ;;  %v882_v47 = vsel %vm850_vm1, %v1915_v6, 0.0  ;;  %v1024_v19 = vadd.f32 %v1023_v39, %v1022_v21 }
 0x1a6   : > { %v937_v53 = vadd.f32 %v936_v17, %v935_v61  ;;  %vm852_vm3 = vcmp.lt.s32.totalorder %v820_v43, 300  ;;  %v940_v7 = vsel %vm888_vm7, %v881_v15, 0.0  ;;  %v981_v37 = vmul.f32 %v2335_v48, %v2335_v48 }
 0x1a7   : > { %v1027_v32 = vsel %vm888_vm7, %v979_v46, 0.0  ;;  %v883_v23 = vsel %vm851_vm2, %v1927_v12, 0.0  ;;  %v1026_v51 = vadd.f32 %v1025_v34, %v1024_v19  ;;  %vm853_vm4 = vcmp.lt.s32.totalorder %v821_v57, 300 }
 0x1a8   : > { %v939_v30 = vadd.f32 %v938_v55, %v937_v53  ;;  %v942_v27 = vsel %vm888_vm7, %v882_v47, 0.0  ;;  %v982_v3 = vmul.f32 %v2345_v35, %v2345_v35  ;;  %v1029_v36 = vsel %vm888_vm7, %v980_v25, 0.0 }
 0x1a9   : > { %v884_v42 = vsel %vm852_vm3, %v1935_v16, 0.0  ;;  %v1028_v1 = vadd.f32 %v1027_v32, %v1026_v51  ;;  %vm854_vm5 = vcmp.lt.s32.totalorder %v822_v28, 300  ;;  %v944_v48 = vsel %vm888_vm7, %v883_v23, 0.0 }
 0x1aa   : > { %v941_v45 = vadd.f32 %v940_v7, %v939_v30  ;;  %v983_v63 = vmul.f32 %v2355_v20, %v2355_v20  ;;  %v1031_v41 = vsel %vm888_vm7, %v981_v37, 0.0  ;;  %v885_v24 = vsel %vm853_vm4, %v1923_v10, 0.0 }
 0x1ab   : > { %v1030_v22 = vadd.f32 %v1029_v36, %v1028_v1  ;;  %v946_v35 = vsel %vm888_vm7, %v884_v42, 0.0  ;;  %v984_v26 = vmul.f32 %v2365_v44, %v2365_v44  ;;  %v1033_v18 = vsel %vm888_vm7, %v982_v3, 0.0 }
 0x1ac   : > { %v943_v40 = vadd.f32 %v942_v27, %v941_v45  ;;  %v886_v5 = vsel %vm854_vm5, %v1931_v14, 0.0  ;;  %v948_v38 = vsel %vm888_vm7, %v885_v24, 0.0  ;;  %v985_v20 = vmul.f32 %v2375_v31, %v2375_v31 }
 0x1ad   : > { %v1032_v43 = vadd.f32 %v1031_v41, %v1030_v22  ;;  %v1035_v49 = vsel %vm888_vm7, %v983_v63, 0.0  ;;  %v950_v39 = vsel %vm888_vm7, %v886_v5, 0.0  ;;  %v986_v57 = vmul.f32 %v879_v29, %v879_v29 }
 0x1ae   : > { %v945_v33 = vadd.f32 %v944_v48, %v943_v40  ;;  %v1037_v44 = vsel %vm888_vm7, %v984_v26, 0.0  ;;  %v987_v55 = vmul.f32 %v880_v59, %v880_v59  ;;  %v1039_v25 = vsel %vm888_vm7, %v985_v20, 0.0 }
 0x1af   : > { %v1034_v46 = vadd.f32 %v1033_v18, %v1032_v43  ;;  %v988_v53 = vmul.f32 %v881_v15, %v881_v15  ;;  %v1041_v19 = vsel %vm888_vm7, %v986_v57, 0.0  ;;  %v989_v37 = vmul.f32 %v882_v47, %v882_v47  ;;  %v887_v47 = vld [vmem:[#allocation2] sm:$0x1] }
 0x1b0   : > { %v947_v17 = vadd.f32 %v946_v35, %v945_v33  ;;  %v1043_v32 = vsel %vm888_vm7, %v987_v55, 0.0  ;;  %v990_v29 = vmul.f32 %v883_v23, %v883_v23  ;;  %v991_v59 = vmul.f32 %v884_v42, %v884_v42 }
 0x1b1   : > { %v1036_v21 = vadd.f32 %v1035_v49, %v1034_v46  ;;  %v1045_v27 = vsel %vm888_vm7, %v988_v53, 0.0  ;;  %v1047_v45 = vsel %vm888_vm7, %v989_v37, 0.0  ;;  %v992_v15 = vmul.f32 %v885_v24, %v885_v24 }
 0x1b2   : > { %v949_v61 = vadd.f32 %v948_v38, %v947_v17  ;;  %v1049_v63 = vsel %vm888_vm7, %v990_v29, 0.0  ;;  %v993_v22 = vmul.f32 %v886_v5, %v886_v5  ;;  %v1051_v35 = vsel %vm888_vm7, %v991_v59, 0.0 }
 0x1b3   : > { %v1038_v28 = vadd.f32 %v1037_v44, %v1036_v21  ;;  %vm959_vm6 = vcmask 253952   ;;  %v1053_v18 = vsel %vm888_vm7, %v992_v15, 0.0 }
 0x1b4   : > { %v951_v34 = vadd.f32 %v950_v39, %v949_v61  ;;  %v1055_v43 = vsel %vm888_vm7, %v993_v22, 0.0  ;;  %v961_v39 = vld [vmem:[#allocation3] sm:$0x1] }
 0x1b5   : > { %v1040_v7 = vadd.f32 %v1039_v25, %v1038_v28 }
 0x1b6   : > { %v952_v31 = vrot.slane %v951_v34, 4 }
 0x1b7   : > { %v1042_v51 = vadd.f32 %v1041_v19, %v1040_v7 }
 0x1b8   : > { %v953_v30 = vadd.f32 %v952_v31, %v951_v34  ;;  %v1072_v31 = vld [vmem:[%s2646_s2] sm:$0x1] }
 0x1b9   : > { %v1044_v36 = vadd.f32 %v1043_v32, %v1042_v51  ;;  %v1077_v32 = vld [vmem:[%s2647_s3] sm:$0x1] }
 0x1ba   : > { %v954_v3 = vrot.slane %v953_v30, 2 }
 0x1bb   : > { %v1046_v48 = vadd.f32 %v1045_v27, %v1044_v36 }
 0x1bc   : > { %v955_v1 = vadd.f32 %v954_v3, %v953_v30 }
 0x1bd   : > { %v1048_v40 = vadd.f32 %v1047_v45, %v1046_v48 }
 0x1be   : > { %v956_v41 = vrot.slane %v955_v1, 1 }
 0x1bf   : > { %v1050_v23 = vadd.f32 %v1049_v63, %v1048_v40 }
 0x1c0   : > { %v957_v26 = vadd.f32 %v956_v41, %v955_v1 }
 0x1c1   : > { %v1052_v42 = vadd.f32 %v1051_v35, %v1050_v23 }
 0x1c2   : > { %v958_v33 = vadd.f32 %v957_v26, %v887_v47 }
 0x1c3   : > { %v1054_v24 = vadd.f32 %v1053_v18, %v1052_v42 }
 0x1c4   : > { %960 = vst.msk [vmem:[#allocation2] sm:$0x1] %vm959_vm6, %v958_v33 }
 0x1c5   : > { %v1056_v38 = vadd.f32 %v1055_v43, %v1054_v24 }
 0x1c7   : > { %v1057_v20 = vrot.slane %v1056_v38, 4 }
 0x1c9   : > { %v1058_v49 = vadd.f32 %v1057_v20, %v1056_v38 }
 0x1cb   : > { %v1059_v17 = vrot.slane %v1058_v49, 2  ;;  %v1065_v61 = vld [vmem:[#allocation2] sm:$0x1] }
 0x1cc   : > { %v1066_v21 = vmul.f32 0.0033333334, %v1065_v61 }
 0x1cd   : > { %v1060_v46 = vadd.f32 %v1059_v17, %v1058_v49 }
 0x1ce   : > { %v1069_v55 = vmul.f32 %v1066_v21, %v1066_v21 }
 0x1cf   : > { %v1061_v5 = vrot.slane %v1060_v46, 1 }
 0x1d1   : > { %v1062_v57 = vadd.f32 %v1061_v5, %v1060_v46 }
 0x1d3   : > { %v1063_v44 = vadd.f32 %v1062_v57, %v961_v39 }
 0x1d5   : > { %1064 = vst.msk [vmem:[#allocation3] sm:$0x1] %vm959_vm6, %v1063_v44 }
 0x1dc   : > { %v1067_v25 = vld [vmem:[#allocation3] sm:$0x1] }
 0x1dd   : > { %v1068_v34 = vmul.f32 0.0033333334, %v1067_v25 }
 0x1df   : > { %v1070_v28 = vsub.f32 %v1068_v34, %v1069_v55 }
 0x1e1   : > { %v1071_v53 = vmax.f32 %v1070_v28, 0.0 }
 0x1e3   : > { %v1073_v19 = vadd.f32 1e-05, %v1071_v53 }
 0x1e5   : > { %1597 = vrsqrt.f32 %v1073_v19 }
 0x1f2   : > { %v1598_v7 = vpop.eup %1597 }
 0x1f3   : > { %v1075_v37 = vmul.f32 %v1598_v7, %v1072_v31 }
 0x1f5   : > { %1076 = vst.msk [vmem:[#allocation2] sm:$0x1] %vm959_vm6, %v1075_v37  ;;  %v1078_v30 = vmul.f32 %v1075_v37, %v1066_v21 }
 0x1f7   : > { %v1079_v51 = vsub.f32 %v1077_v32, %v1078_v30 }
 0x1f9   : > { %1080 = vst.msk [vmem:[#allocation3] sm:$0x1] %vm959_vm6, %v1079_v51 }
 0x1fa PF: > { %p1431_p7 = scmp.ne.s32.totalorder %s1680_s25, 1 }
 0x1fc   : > { %1084 = sbr.rel (%p1431_p7) target bundleno = 785 (0x311), region = 60 }
 0x201   : > { %v2453_v29 = vld [vmem:[#allocation2] ss:$0 sm:$0xff]  ;;  %v2455_v27 = vld [vmem:[#allocation3] ss:$0 sm:$0xff]  ;;  %vm1218_vm7 = vcmask 261120   ;;  %v1695_v48 = vmov 0  }
 0x202   : > { %v1122_v3 = vmul.f32 %v1923_v10, %v2453_v29  ;;  %v1123_v36 = vmul.f32 %v1931_v14, %v2453_v29  ;;  %v1106_v59 = vmul.f32 %v1921_v9, %v2453_v29  ;;  %v1107_v45 = vmul.f32 %v1929_v13, %v2453_v29  ;;  %v2468_v1 = vld [vmem:[%s2648_s4] sm:$0xf]  ;;  %1599 = vset.pattern.permute.xlu0 %v1695_v48  ;;  %v2682_v44 = vld [vmem:[#allocation17_spill] sm:$0xff]  ;;  %v2683_v30 = vld [vmem:[#allocation16_spill] sm:$0xff] }
 0x203   : > { %v1212_v10 = vld [vmem:[%s2649_s5] sm:$0xff]  ;;  %v1120_v14 = vmul.f32 %v2453_v29, %v1927_v12  ;;  %v1121_v9 = vmul.f32 %v2453_v29, %v1935_v16  ;;  %v1104_v13 = vmul.f32 %v2453_v29, %v1925_v11  ;;  %1478 = vmatprep.mubr.msk.bf16.mxu0 %vm1218_vm7, %v2468_v1  ;;  %v1118_v17 = vmul.f32 %v1907_v2, %v2453_v29 }
 0x204   : > { %v2680_v15 = vld [vmem:[#allocation19_spill] sm:$0xff]  ;;  %v1161_v41 = vadd.f32 %v2455_v27, %v1122_v3  ;;  %v1162_v40 = vadd.f32 %v2455_v27, %v1123_v36  ;;  %v1145_v47 = vadd.f32 %v2455_v27, %v1106_v59  ;;  %v1146_v12 = vadd.f32 %v2455_v27, %v1107_v45  ;;  %1215 = vperm.xlu0 %1599, %v1212_v10   ;;  %v2684_v59 = vld [vmem:[#allocation18_spill] sm:$0xff] }
 0x205   : > { %v1105_v63 = vmul.f32 %v2453_v29, %v2680_v15  ;;  %v1159_v16 = vadd.f32 %v2455_v27, %v1120_v14  ;;  %v1160_v22 = vadd.f32 %v2455_v27, %v1121_v9  ;;  %v1143_v11 = vadd.f32 %v2455_v27, %v1104_v13  ;;  %v2681_v39 = vld [vmem:[#allocation15_spill] sm:$0xff] }
 0x206   : > { %v1193_v26 = vmax.f32 %v1161_v41, 0.0  ;;  %v1194_v23 = vmax.f32 %v1162_v40, 0.0  ;;  %v1177_v18 = vmax.f32 %v1145_v47, 0.0  ;;  %v1178_v33 = vmax.f32 %v1146_v12, 0.0  ;;  %v2685_v40 = vld [vmem:[#allocation11_spill] sm:$0xff]  ;;  %v2686_v12 = vld [vmem:[#allocation13_spill] sm:$0xff] }
 0x207   : > { %v1144_v35 = vadd.f32 %v2455_v27, %v1105_v63  ;;  %v1191_v42 = vmax.f32 %v1159_v16, 0.0  ;;  %v1192_v43 = vmax.f32 %v1160_v22, 0.0  ;;  %v1175_v24 = vmax.f32 %v1143_v11, 0.0 }
 0x208   : > { %v1211_v20 = vpack.c.bf16 %v1194_v23, %v1193_v26  ;;  %v1203_v49 = vpack.c.bf16 %v1178_v33, %v1177_v18  ;;  %v1119_v46 = vmul.f32 %v1915_v6, %v2453_v29  ;;  %v1102_v57 = vmul.f32 %v2681_v39, %v2453_v29 }
 0x209   : > { %v1176_v38 = vmax.f32 %v1144_v35, 0.0  ;;  %v1210_v5 = vpack.c.bf16 %v1192_v43, %v1191_v42  ;;  %v1103_v61 = vmul.f32 %v2682_v44, %v2453_v29  ;;  %v1157_v55 = vadd.f32 %v2455_v27, %v1118_v17  ;;  %v2688_v17 = vld [vmem:[#allocation14_spill] sm:$0xff] }
 0x20a   : > { %1516 = vmatprep.subr.msk.bf16.mxu0 %vm1218_vm7, %v1211_v20  ;;  %v1244_v21 = vsel %vm1218_vm7, %v1203_v49, 0  ;;  %v1158_v25 = vadd.f32 %v2455_v27, %v1119_v46  ;;  %v1141_v34 = vadd.f32 %v2455_v27, %v1102_v57  ;;  %v1116_v6 = vmul.f32 %v2453_v29, %v1911_v4  ;;  %v2687_v20 = vld [vmem:[#allocation12_spill] sm:$0xff] }
 0x20b   : > { %1463 = vmatpush3.bf16.xpose.msra.mxu0 %v1244_v21  ;;  %v1202_v2 = vpack.c.bf16 %v1176_v38, %v1175_v24  ;;  %v1189_v28 = vmax.f32 %v1157_v55, 0.0  ;;  %v1142_v19 = vadd.f32 %v2455_v27, %v1103_v61  ;;  %v1117_v31 = vmul.f32 %v2453_v29, %v1919_v8 }
 0x20c   : > { %1517 = vmatprep.subr.msk.bf16.mxu0 %vm1218_vm7, %v1210_v5  ;;  %v1190_v53 = vmax.f32 %v1158_v25, 0.0  ;;  %v1173_v37 = vmax.f32 %v1141_v34, 0.0  ;;  %v1155_v32 = vadd.f32 %v2455_v27, %v1116_v6  ;;  %v1100_v51 = vmul.f32 %v2453_v29, %v2683_v30 }
 0x20d   : > { %v1241_v7 = vsel %vm1218_vm7, %v1202_v2, 0  ;;  %v1174_v36 = vmax.f32 %v1142_v19, 0.0  ;;  %v1156_v4 = vadd.f32 %v2455_v27, %v1117_v31  ;;  %v1101_v45 = vmul.f32 %v2453_v29, %v2684_v59 }
 0x20e   : > { %v1209_v3 = vpack.c.bf16 %v1190_v53, %v1189_v28  ;;  %v1187_v48 = vmax.f32 %v1155_v32, 0.0  ;;  %v1139_v10 = vadd.f32 %v2455_v27, %v1100_v51  ;;  %v1114_v8 = vmul.f32 %v1891_v58, %v2453_v29  ;;  %v2689_v53 = vld [vmem:[#allocation7_spill] sm:$0xff]  ;;  %v2690_v32 = vld [vmem:[#allocation9_spill] sm:$0xff] }
 0x20f   : > { %v1201_v14 = vpack.c.bf16 %v1174_v36, %v1173_v37  ;;  %v1188_v9 = vmax.f32 %v1156_v4, 0.0  ;;  %v1140_v13 = vadd.f32 %v2455_v27, %v1101_v45  ;;  %v1115_v15 = vmul.f32 %v1899_v62, %v2453_v29 }
 0x210   : > { %v1171_v63 = vmax.f32 %v1139_v10, 0.0  ;;  %v1153_v41 = vadd.f32 %v2455_v27, %v1114_v8  ;;  %v1098_v47 = vmul.f32 %v2685_v40, %v2453_v29  ;;  %v1099_v16 = vmul.f32 %v2686_v12, %v2453_v29  ;;  %v2691_v8 = vld [vmem:[#allocation8_spill] sm:$0xff] }
 0x211   : > { %v1238_v58 = vsel %vm1218_vm7, %v1201_v14, 0  ;;  %v1208_v22 = vpack.c.bf16 %v1188_v9, %v1187_v48  ;;  %v1172_v11 = vmax.f32 %v1140_v13, 0.0  ;;  %v1154_v35 = vadd.f32 %v2455_v27, %v1115_v15  ;;  %v2692_v15 = vld [vmem:[#allocation10_spill] sm:$0xff] }
 0x212   : > { %v1185_v26 = vmax.f32 %v1153_v41, 0.0  ;;  %v1137_v23 = vadd.f32 %v2455_v27, %v1098_v47  ;;  %v1138_v62 = vadd.f32 %v2455_v27, %v1099_v16  ;;  %v1112_v42 = vmul.f32 %v2453_v29, %v1895_v60 }
 0x213   : > { %1465 = vmatpush3.bf16.xpose.msra.mxu0 %v1241_v7  ;;  %v1200_v18 = vpack.c.bf16 %v1172_v11, %v1171_v63  ;;  %v1186_v33 = vmax.f32 %v1154_v35, 0.0  ;;  %v1113_v43 = vmul.f32 %v2453_v29, %v1903_v0  ;;  %v1096_v49 = vmul.f32 %v2453_v29, %v2687_v20 }
 0x214   : > { %1518 = vmatprep.subr.msk.bf16.mxu0 %vm1218_vm7, %v1209_v3  ;;  %v1169_v24 = vmax.f32 %v1137_v23, 0.0  ;;  %v1170_v38 = vmax.f32 %v1138_v62, 0.0  ;;  %v1097_v46 = vmul.f32 %v2453_v29, %v2688_v17  ;;  %v1151_v57 = vadd.f32 %v2455_v27, %v1112_v42 }
 0x215   : > { %v1235_v5 = vsel %vm1218_vm7, %v1200_v18, 0  ;;  %v1207_v39 = vpack.c.bf16 %v1186_v33, %v1185_v26  ;;  %v1152_v44 = vadd.f32 %v2455_v27, %v1113_v43  ;;  %v1135_v61 = vadd.f32 %v2455_v27, %v1096_v49 }
 0x216   : > { %v1199_v60 = vpack.c.bf16 %v1170_v38, %v1169_v24  ;;  %v1136_v0 = vadd.f32 %v2455_v27, %v1097_v46  ;;  %v1183_v21 = vmax.f32 %v1151_v57, 0.0  ;;  %v1110_v25 = vmul.f32 %v1875_v50, %v2453_v29 }
 0x217   : > { %v1184_v55 = vmax.f32 %v1152_v44, 0.0  ;;  %v1111_v2 = vmul.f32 %v1883_v54, %v2453_v29  ;;  %v1167_v6 = vmax.f32 %v1135_v61, 0.0  ;;  %v1094_v19 = vmul.f32 %v2689_v53, %v2453_v29 }
 0x218   : > { %v1232_v34 = vsel %vm1218_vm7, %v1199_v60, 0  ;;  %v1168_v28 = vmax.f32 %v1136_v0, 0.0  ;;  %v1149_v7 = vadd.f32 %v2455_v27, %v1110_v25  ;;  %v1095_v30 = vmul.f32 %v2690_v32, %v2453_v29 }
 0x219   : > { %v1206_v31 = vpack.c.bf16 %v1184_v55, %v1183_v21  ;;  %v1150_v37 = vadd.f32 %v2455_v27, %v1111_v2  ;;  %v1133_v51 = vadd.f32 %v2455_v27, %v1094_v19  ;;  %v1108_v54 = vmul.f32 %v2453_v29, %v1879_v52 }
 0x21a   : > { %v1198_v50 = vpack.c.bf16 %v1168_v28, %v1167_v6  ;;  %v1181_v3 = vmax.f32 %v1149_v7, 0.0  ;;  %v1134_v4 = vadd.f32 %v2455_v27, %v1095_v30  ;;  %v1109_v59 = vmul.f32 %v2453_v29, %v1887_v56 }
 0x21b   : > { %1467 = vmatpush3.bf16.xpose.msra.mxu0 %v1238_v58  ;;  %v1182_v36 = vmax.f32 %v1150_v37, 0.0  ;;  %v1165_v48 = vmax.f32 %v1133_v51, 0.0  ;;  %v1147_v10 = vadd.f32 %v2455_v27, %v1108_v54  ;;  %v1092_v14 = vmul.f32 %v2453_v29, %v2691_v8 }
 0x21c   : > { %1519 = vmatprep.subr.msk.bf16.mxu0 %vm1218_vm7, %v1208_v22  ;;  %v1229_v45 = vsel %vm1218_vm7, %v1198_v50, 0  ;;  %v1166_v13 = vmax.f32 %v1134_v4, 0.0  ;;  %v1148_v52 = vadd.f32 %v2455_v27, %v1109_v59  ;;  %v1093_v63 = vmul.f32 %v2453_v29, %v2692_v15 }
 0x21d   : > { %v1205_v9 = vpack.c.bf16 %v1182_v36, %v1181_v3  ;;  %v1179_v41 = vmax.f32 %v1147_v10, 0.0  ;;  %v1131_v47 = vadd.f32 %v2455_v27, %v1092_v14 }
 0x21e   : > { %v1197_v56 = vpack.c.bf16 %v1166_v13, %v1165_v48  ;;  %v1180_v40 = vmax.f32 %v1148_v52, 0.0  ;;  %v1132_v12 = vadd.f32 %v2455_v27, %v1093_v63 }
 0x21f   : > { %v1163_v22 = vmax.f32 %v1131_v47, 0.0 }
 0x220   : > { %v1226_v16 = vsel %vm1218_vm7, %v1197_v56, 0  ;;  %v1204_v58 = vpack.c.bf16 %v1180_v40, %v1179_v41  ;;  %v1164_v11 = vmax.f32 %v1132_v12, 0.0 }
 0x222   : > { %v1196_v29 = vpack.c.bf16 %v1164_v11, %v1163_v22 }
 0x223   : > { %1469 = vmatpush3.bf16.xpose.msra.mxu0 %v1235_v5 }
 0x224   : > { %1520 = vmatprep.subr.msk.bf16.mxu0 %vm1218_vm7, %v1207_v39  ;;  %v1223_v35 = vsel %vm1218_vm7, %v1196_v29, 0 }
 0x22b   : > { %1471 = vmatpush3.bf16.xpose.msra.mxu0 %v1232_v34 }
 0x22c   : > { %1521 = vmatprep.subr.msk.bf16.mxu0 %vm1218_vm7, %v1206_v31 }
 0x233   : > { %1473 = vmatpush3.bf16.xpose.msra.mxu0 %v1229_v45 }
 0x234   : > { %1522 = vmatprep.subr.msk.bf16.mxu0 %vm1218_vm7, %v1205_v9 }
 0x23b   : > { %1475 = vmatpush3.bf16.xpose.msra.mxu0 %v1226_v16 }
 0x23c   : > { %1523 = vmatprep.subr.msk.bf16.mxu0 %vm1218_vm7, %v1204_v58 }
 0x243   : > { %1477 = vmatpush3.bf16.xpose.msra.mxu0 %v1223_v35 }
 0x24a   : > { %1479 = vmatmul.mubr.msk.bf16.vlgmr.msra.gmra.mxu0 %vm1218_vm7, %v2468_v1 }
 0x27f   : > { %v1216_v26 = vpop.permute.xlu0 %1215 }
 0x30a   : > { %v1304_v23 = vpop.f32.mrf.mxu0 }
 0x30b   : > { %v1305_v62 = vadd.f32 %v1304_v23, %v1216_v26 }
 0x30c   : > { %v1306_v27 = vpop.f32.mrf.mxu0 }
 0x30d   : > { %1311 = vst [vmem:[%s1938_s14] sm:$0xff] %v1305_v62  ;;  %v1307_v18 = vadd.f32 %v1306_v27, %v1216_v26 }
 0x30e   : > { %v1308_v33 = vpop.f32.mrf.mxu0 }
 0x30f   : > { %1312 = vst [vmem:[%s1938_s14 + $0x8] sm:$0xff] %v1307_v18 }
 0x310   : > { %v1309_v42 = vpop.f32.mrf.mxu0 }
 0x311 PF: > { %s2585_s17 = scalar_lea.sflag [#allocation5], %s269_s16  ;;  %1320 = sbr.rel (!%p1785_p6) target bundleno = 818 (0x332), region = 64 }
 0x312   : > { %s1321_s18 = smul.u32 (%p1785_p6), %s1676_s24, %s1680_s25 }
 0x314   : > { %s1436_s19 = sshll.u32 (%p1785_p6), %s1321_s18, 1 }
 0x315   : > { %s1323_s20 = ssub.s32 (%p1785_p6), 3, %s1436_s19 }
 0x316   : > { %p1324_p9 = scmp.lt.s32.totalorder %s1323_s20, 2 }
 0x318   : > { %s2709_s20 = smov (!%p1324_p9, %s1323_s20), 2 }
 0x319   : > { %s2591_s29 = sshll.u32 %s2709_s20, 7 }
 0x31a   : > { %s1328_s30 = ssub.s32 256, %s2591_s29 }
 0x31b   : > { %1329 = vsyncadd %s2585_s17, %s1328_s30  ;;  %p1438_p10 = scmp.ne.s32.totalorder %s2591_s29, 0  ;;  %s1444_s10 = sshll.u32 %s1321_s18, 8 }
 0x31c   : > { %s1332_s12 = scalar_lea.hbm %s2650_s6, %s1444_s10  ;;  %s1335_s24 = sshll.u32 %s1938_s14, 4  ;;  %s1336_s24 = int_to_ptr.vmem [resolvable:$true] %s1335_s24 }
 0x31d   : > { %s1600_s25 = scalar_lea.vmem %s1336_s24, %s2591_s29  ;;  %s1696_s13 = smov [#allocation4]  }
 0x31e   : > { %p1601_p6 = scmp.ne.s32.totalorder %s1336_s24, %s1600_s25  ;;  %s1604_s19 = sshll.u32 %s1696_s13, 4  ;;  %s1605_s19 = int_to_ptr.vmem [resolvable:$false] %s1604_s19 }
 0x31f   : > { %s1606_s20 = scalar_lea.vmem %s1605_s19, 512  ;;  %p1607_p13 = scmp.lt.s32.totalorder %s1336_s24, %s1605_s19 }
 0x320   : > { %p1602_p11 = pnand %p1601_p6, %p1438_p10  ;;  %p1608_p0 = scmp.lt.s32.totalorder %s1606_s20, %s1600_s25 }
 0x322   : > { %p1603_p12 = pneg %p1602_p11  ;;  %p1609_p1 = por %p1608_p0, %p1607_p13 }
 0x324   : > { %p1610_p2 = pnand %p1609_p1, %p1603_p12 }
 0x326   : > { %1613 = shalt.err (!%p1610_p2)
}
 0x327   : > { %s1614_s18 = scalar_lea.hbm %s1332_s12, %s2591_s29  ;;  %s1618_s10 = scalar_lea.hbm %s2650_s6, 384 }
 0x328   : > { %p1615_p3 = scmp.ne.s32.totalorder %s1332_s12, %s1614_s18  ;;  %p1619_p7 = scmp.lt.s32.totalorder %s1332_s12, %s2650_s6 }
 0x329   : > { %p1620_p9 = scmp.lt.s32.totalorder %s1618_s10, %s1614_s18 }
 0x32a   : > { %p1616_p4 = pnand %p1615_p3, %p1438_p10 }
 0x32b   : > { %p1621_p6 = por %p1620_p9, %p1619_p7 }
 0x32c   : > { %p1617_p5 = pneg %p1616_p4 }
 0x32e   : > { %p1622_p11 = pnand %p1621_p6, %p1617_p5 }
 0x330   : > { %1625 = shalt.err (!%p1622_p11)
}
 0x331   : > { %1338 = dma.vmem_to_hbm [thread:$0]  (%p1438_p10), %s1336_s24, %s2591_s29, %s1332_s12, %s2585_s17  }
 0x332 PF: > { %p1529_p12 = scmp.ge.s32.totalorder %s1692_s28, 2  ;;  %s1347_s25 = sand.u32 1, %s1664_s21  }
 0x333   : > { %s1348_s13 = scalar_lea.sflag [#allocation5], %s1347_s25 }
 0x334   : > { %p1526_p13 = pnand %p1529_p12, %p1792_p8 }
 0x336   : > { %p1527_p0 = pneg %p1526_p13 }
 0x338   : > { %1659 = dma.done.wait (%p1527_p0), %s1348_s13, 256  }
 0x339   : > { %1661 = vsyncadd (%p1527_p0), %s1348_s13, 4294967040  ;;  %s19_s28 = sadd.s32 1, %s1692_s28   ;;  %s2693_s21 = smov %s1668_s22 }
 0x33a   : > { %p16_p1 = scmp.ge.s32.totalorder %s19_s28, 6   ;;  %s2694_s22 = smov %s1672_s23 }
 0x33b   : > { %s2695_s23 = smov %s1801_s15  ;;  %s2696_s24 = smov %s1684_s26 }
 0x33c   : > { %s2697_s25 = smov %s1688_s27  ;;  %s2698_s26 = smov %s2701_s7 }
 0x33d   : > { %s2699_s27 = smov %s2705_s8  ;;  %18 = sbr.rel (!%p16_p1) target bundleno = 5 (0x5), region = 95 }
 0x342   :  { %1353 = vsyncpa [#allocation5], 1 }
 0x343   :  { %1355 = vsyncpa [#allocation5 + $0x1], 1 }

</bundles_post_ra>
